<compile_context>
chip_gen: v5e
topology: v5e:2x2
jax: 0.10.0
libtpu: 0.0.40
codegen_flags: <defaults>
</compile_context>

<pallas_src>
import collections
import functools
import math

import jax
import jax.numpy as jnp
from jax import lax
from jax.experimental import pallas as pl
from jax.experimental.pallas import tpu as pltpu

LEAKY_SLOPE = 0.2
BN_EPS = 1e-5


def _round_up(x, m):
    return ((x + m - 1) // m) * m


def _tile_limits():
    """Generation-aware M-tile cap and scoped-VMEM budget."""
    try:
        vmem = int(pltpu.get_tpu_info().vmem_capacity_bytes)
    except Exception:
        vmem = 64 * 1024 * 1024
    if vmem >= 128 * 1024 * 1024:          # v5e / v6e: 128 MiB VMEM
        return 1024, 64 * 1024 * 1024
    return 512, 32 * 1024 * 1024           # v7x: 64 MiB VMEM


MAX_TM, VMEM_LIMIT = _tile_limits()


def _m_tiling(M):
    # bf16 operands pack 16 rows per vreg -> keep M tiles 16-aligned.
    m16 = _round_up(M, 16)
    if m16 <= MAX_TM:
        return m16, m16
    return MAX_TM, _round_up(M, MAX_TM)


# ----------------------------- Pallas kernels ------------------------------

def _apply_act(y, act):
    if act == "leaky":
        return jnp.where(y >= 0, y, LEAKY_SLOPE * y)
    if act == "tanh":
        return jnp.tanh(y)
    return y


def _gemm_act_kernel(a_ref, w_ref, o_ref, *, act):
    # Whole (K_pad, N_pad) weight resident in VMEM -> single dot, fused activation.
    y = jnp.dot(a_ref[...], w_ref[...], preferred_element_type=jnp.float32)
    o_ref[...] = _apply_act(y, act).astype(o_ref.dtype)


def _gemm_stats_kernel(a_ref, w_ref, o_ref, st_ref):
    # Conv GEMM that also emits per-M-tile partial BatchNorm statistics
    # (row 0: per-column sums, row 1: per-column sums of squares).  Padded M rows of A
    # are zero so they contribute nothing -> no masking; per-tile partials keep the M
    # grid axis "parallel" (v7x megacore safe).
    y = jnp.dot(a_ref[...], w_ref[...], preferred_element_type=jnp.float32)
    o_ref[...] = y.astype(o_ref.dtype)
    st_ref[0:1, :] = jnp.sum(y, axis=0, keepdims=True)
    st_ref[1:2, :] = jnp.sum(y * y, axis=0, keepdims=True)


def _gemm_sampler_kernel(a_ref, w_ref, b_ref, eps_ref, o_ref):
    # Fused mu/logvar head + reparameterization: conv1 weights occupy lanes [0,128),
    # conv2 weights lanes [128,256); z = mu + eps * exp(0.5*logvar) (exp on the EUP).
    y = jnp.dot(a_ref[...], w_ref[...], preferred_element_type=jnp.float32) + b_ref[...]
    half = y.shape[1] // 2
    mu = y[:, :half]
    logvar = y[:, half:]
    z = mu + eps_ref[...] * jnp.exp(0.5 * logvar)
    o_ref[...] = z.astype(o_ref.dtype)


def _affine_act_kernel(x_ref, scale_ref, shift_ref, o_ref, *, act):
    # BatchNorm apply (per-column scale/shift) + activation; bf16 in / bf16 out,
    # math in f32.
    y = x_ref[...].astype(jnp.float32) * scale_ref[...] + shift_ref[...]
    o_ref[...] = _apply_act(y, act).astype(o_ref.dtype)


# ------------------------------ kernel wrappers -----------------------------

def _pad2d(a, rows, cols, dtype):
    r, c = a.shape
    a = a.astype(dtype)
    if r == rows and c == cols:
        return a
    return jnp.zeros((rows, cols), dtype).at[:r, :c].set(a)


def _compiler_params(semantics):
    return pltpu.CompilerParams(dimension_semantics=semantics,
                                vmem_limit_bytes=VMEM_LIMIT)


def gemm_act(a, w_pad, *, act="none", out_dtype=jnp.bfloat16):
    """(M,K) x (K_pad,N_pad) GEMM, bf16 operands / f32 accumulation, fused activation."""
    M, _ = a.shape
    K_pad, N_pad = w_pad.shape
    TM, M_pad = _m_tiling(M)
    a_p = _pad2d(a, M_pad, K_pad, jnp.bfloat16)
    return pl.pallas_call(
        functools.partial(_gemm_act_kernel, act=act),
        out_shape=jax.ShapeDtypeStruct((M_pad, N_pad), out_dtype),
        grid=(M_pad // TM,),
        in_specs=[pl.BlockSpec((TM, K_pad), lambda m: (m, 0)),
                  pl.BlockSpec((K_pad, N_pad), lambda m: (0, 0))],
        out_specs=pl.BlockSpec((TM, N_pad), lambda m: (m, 0)),
        compiler_params=_compiler_params(("parallel",)),
    )(a_p, w_pad)


def gemm_stats(a, w_pad, *, out_dtype=jnp.bfloat16):
    """GEMM + per-M-tile partial BatchNorm sums.  Returns (y_pad, col_sum, col_ssq)."""
    M, _ = a.shape
    K_pad, N_pad = w_pad.shape
    TM, M_pad = _m_tiling(M)
    num_m = M_pad // TM
    a_p = _pad2d(a, M_pad, K_pad, jnp.bfloat16)
    y, st = pl.pallas_call(
        _gemm_stats_kernel,
        out_shape=(jax.ShapeDtypeStruct((M_pad, N_pad), out_dtype),
                   jax.ShapeDtypeStruct((num_m * 8, N_pad), jnp.float32)),
        grid=(num_m,),
        in_specs=[pl.BlockSpec((TM, K_pad), lambda m: (m, 0)),
                  pl.BlockSpec((K_pad, N_pad), lambda m: (0, 0))],
        out_specs=(pl.BlockSpec((TM, N_pad), lambda m: (m, 0)),
                   pl.BlockSpec((8, N_pad), lambda m: (m, 0))),
        compiler_params=_compiler_params(("parallel",)),
    )(a_p, w_pad)
    st = st.reshape(num_m, 8, N_pad)
    return y, jnp.sum(st[:, 0, :], axis=0), jnp.sum(st[:, 1, :], axis=0)


def gemm_mu_logvar_sample(a, w_pad, b_pad, eps, *, out_dtype=jnp.bfloat16):
    """Fused mu/logvar GEMM + reparameterization; returns padded z (M_pad, 128)."""
    M, _ = a.shape
    K_pad, N_pad = w_pad.shape
    half = N_pad // 2
    TM, M_pad = _m_tiling(M)
    a_p = _pad2d(a, M_pad, K_pad, jnp.bfloat16)
    eps_p = _pad2d(eps, M_pad, half, jnp.float32)
    return pl.pallas_call(
        _gemm_sampler_kernel,
        out_shape=jax.ShapeDtypeStruct((M_pad, half), out_dtype),
        grid=(M_pad // TM,),
        in_specs=[pl.BlockSpec((TM, K_pad), lambda m: (m, 0)),
                  pl.BlockSpec((K_pad, N_pad), lambda m: (0, 0)),
                  pl.BlockSpec((1, N_pad), lambda m: (0, 0)),
                  pl.BlockSpec((TM, half), lambda m: (m, 0))],
        out_specs=pl.BlockSpec((TM, half), lambda m: (m, 0)),
        compiler_params=_compiler_params(("parallel",)),
    )(a_p, w_pad, b_pad, eps_p)


def bn_leaky_apply(y_pad, col_sum, col_ssq, gamma, beta, *, m_valid, groups,
                   out_dtype=jnp.bfloat16):
    """Training-mode BatchNorm2d (biased batch variance) + LeakyReLU(0.2).

    `groups` column groups share each channel (1 for plain convs, 4 for sub-pixel
    deconv phases, 16 for the 1x1-latent head).  The O(C) stat finalization is
    negligible XLA glue; the per-element normalization is the gridded Pallas pass.
    """
    M_pad, N_pad = y_pad.shape
    C = gamma.shape[0]
    nv = groups * C
    s = jnp.sum(col_sum[:nv].reshape(groups, C), axis=0)
    ss = jnp.sum(col_ssq[:nv].reshape(groups, C), axis=0)
    count = jnp.float32(m_valid * groups)
    mean = s / count
    var = jnp.maximum(ss / count - mean * mean, 0.0)
    scale_c = gamma.astype(jnp.float32) * lax.rsqrt(var + BN_EPS)
    shift_c = beta.astype(jnp.float32) - mean * scale_c
    scale = jnp.zeros((1, N_pad), jnp.float32).at[0, :nv].set(jnp.tile(scale_c, groups))
    shift = jnp.zeros((1, N_pad), jnp.float32).at[0, :nv].set(jnp.tile(shift_c, groups))
    TM, _ = _m_tiling(M_pad)
    return pl.pallas_call(
        functools.partial(_affine_act_kernel, act="leaky"),
        out_shape=jax.ShapeDtypeStruct((M_pad, N_pad), out_dtype),
        grid=(M_pad // TM,),
        in_specs=[pl.BlockSpec((TM, N_pad), lambda m: (m, 0)),
                  pl.BlockSpec((1, N_pad), lambda m: (0, 0)),
                  pl.BlockSpec((1, N_pad), lambda m: (0, 0))],
        out_specs=pl.BlockSpec((TM, N_pad), lambda m: (m, 0)),
        compiler_params=_compiler_params(("parallel",)),
    )(y_pad, scale, shift)


# ------------------------------ conv plumbing (glue) ------------------------

def _im2col_nhwc(x, k, stride, pad):
    # x: (N, H, W, C) -> patches (N*Ho*Wo, k*k*C); K-axis ordering (kh, kw, cin).
    # TODO(synk): in-kernel im2col (k*k shifted matmuls over an NHWC VMEM block) would
    # remove this slab's HBM read amplification.
    N, H, W, C = x.shape
    xp = jnp.pad(x, ((0, 0), (pad, pad), (pad, pad), (0, 0)))
    Ho = (H + 2 * pad - k) // stride + 1
    Wo = (W + 2 * pad - k) // stride + 1
    cols = []
    for i in range(k):
        for j in range(k):
            cols.append(xp[:, i:i + stride * Ho:stride, j:j + stride * Wo:stride, :])
    p = jnp.stack(cols, axis=3)                      # (N, Ho, Wo, k*k, C)
    return p.reshape(N * Ho * Wo, k * k * C), Ho, Wo


def conv4s2_layer(x, w_pad, cout, *, act="none", bn=None):
    # Conv2d(cin, cout, 4, stride=2, pad=1, bias=False) [+ BN + LeakyReLU] in NHWC.
    B = x.shape[0]
    patches, Ho, Wo = _im2col_nhwc(x, 4, 2, 1)
    M = B * Ho * Wo
    if bn is None:
        y = gemm_act(patches, w_pad, act=act)
    else:
        y, cs, cq = gemm_stats(patches, w_pad)
        y = bn_leaky_apply(y, cs, cq, bn[0], bn[1], m_valid=M, groups=1)
    return y[:M, :cout].reshape(B, Ho, Wo, cout)


def deconv4s2_layer(x, w_pad, cout, *, act="none", bn=None, out_dtype=jnp.bfloat16):
    # ConvTranspose2d(cin, cout, 4, stride=2, pad=1, bias=False) via sub-pixel
    # decomposition: exact 3x3 stride-1 conv over the pad-1 input producing the 4
    # output phases as channel groups (ph, pw, cout), then a pixel shuffle.
    B, H, W, _ = x.shape
    patches, _, _ = _im2col_nhwc(x, 3, 1, 1)
    M = B * H * W
    N = 4 * cout
    if bn is None:
        y = gemm_act(patches, w_pad, act=act, out_dtype=out_dtype)
    else:
        y, cs, cq = gemm_stats(patches, w_pad)
        y = bn_leaky_apply(y, cs, cq, bn[0], bn[1], m_valid=M, groups=4,
                           out_dtype=out_dtype)
    y = y[:M, :N].reshape(B, H, W, 2, 2, cout)
    return jnp.transpose(y, (0, 1, 3, 2, 4, 5)).reshape(B, 2 * H, 2 * W, cout)


def deconv_head_layer(z, w_pad, cmax, *, bn):
    # ConvTranspose2d(nz, cmax, 4, stride=1, pad=0) on a 1x1 latent == direct GEMM
    # z(B, nz) x W(nz, 4*4*cmax), reshaped to NHWC (B, 4, 4, cmax); no im2col slab.
    B = z.shape[0]
    y, cs, cq = gemm_stats(z, w_pad)
    y = bn_leaky_apply(y, cs, cq, bn[0], bn[1], m_valid=B, groups=16)
    return y[:B, :16 * cmax].reshape(B, 4, 4, cmax)


# ------------------------------ parameters ----------------------------------

VAEConfig = collections.namedtuple("VAEConfig", ["nc", "ngf", "nz", "image_size"])


def _pad_gemm_weight(wg):
    K, N = wg.shape
    return _pad2d(wg, _round_up(K, 128), _round_up(N, 128), jnp.bfloat16)


def _conv_w_to_gemm(w):
    # Conv2d weight (Cout, Cin, kH, kW) -> (kH*kW*Cin, Cout); K ordering (kh, kw, ci).
    Cout, Cin, kh, kw = w.shape
    return jnp.transpose(w, (2, 3, 1, 0)).reshape(kh * kw * Cin, Cout)


def _deconv_s2_w_to_gemm(w):
    # ConvTranspose2d(k=4, s=2, p=1) weight (Cin, Cout, 4, 4) -> sub-pixel GEMM matrix
    # (9*Cin, 4*Cout): output phase (ph, pw) at block (m, n) reads the 3x3 window of
    # the pad-1 input at (m, n); window tap (r, c) hits kernel tap
    # (kh, kw) = (3+ph-2r, 3+pw-2c) when in range, zero otherwise.
    Cin, Cout, _, _ = w.shape
    zero = jnp.zeros((Cin, Cout), w.dtype)
    k_blocks = []
    for r in range(3):
        for c in range(3):
            phase_blocks = []
            for ph in range(2):
                for pw in range(2):
                    kh = 3 + ph - 2 * r
                    kw = 3 + pw - 2 * c
                    if 0 <= kh < 4 and 0 <= kw < 4:
                        phase_blocks.append(w[:, :, kh, kw])
                    else:
                        phase_blocks.append(zero)
            k_blocks.append(jnp.concatenate(phase_blocks, axis=1))   # (Cin, 4*Cout)
    return jnp.concatenate(k_blocks, axis=0)                          # (9*Cin, 4*Cout)


def init_raw_params(key, cfg):
    # Mirrors the PyTorch module's parameter shapes (simple random init values).
    n = int(math.log2(cfg.image_size))
    assert 2 ** n == cfg.image_size and n >= 3
    keys = iter(jax.random.split(key, 64))

    def w(shape, scale=0.05):
        return scale * jax.random.normal(next(keys), shape, jnp.float32)

    p = {"enc_convs": [], "enc_bns": [], "dec_convs": [], "dec_bns": []}
    p["enc_convs"].append(w((cfg.ngf, cfg.nc, 4, 4)))
    for i in range(n - 3):
        co = cfg.ngf * 2 ** (i + 1)
        p["enc_convs"].append(w((co, cfg.ngf * 2 ** i, 4, 4)))
        p["enc_bns"].append((jnp.ones((co,), jnp.float32), jnp.zeros((co,), jnp.float32)))
    cmax = cfg.ngf * 2 ** (n - 3)
    p["conv1_w"], p["conv1_b"] = w((cfg.nz, cmax, 4, 4)), w((cfg.nz,))
    p["conv2_w"], p["conv2_b"] = w((cfg.nz, cmax, 4, 4)), w((cfg.nz,))
    p["dec_convs"].append(w((cfg.nz, cmax, 4, 4)))
    p["dec_bns"].append((jnp.ones((cmax,), jnp.float32), jnp.zeros((cmax,), jnp.float32)))
    for i in range(n - 3, 0, -1):
        co = cfg.ngf * 2 ** (i - 1)
        p["dec_convs"].append(w((cfg.ngf * 2 ** i, co, 4, 4)))
        p["dec_bns"].append((jnp.ones((co,), jnp.float32), jnp.zeros((co,), jnp.float32)))
    p["dec_convs"].append(w((cfg.ngf, cfg.nc, 4, 4)))
    return p


def pack_params(raw, cfg):
    # One-time pre-packing of every weight into its padded lane-dense bf16 GEMM layout
    # (all transposes / sub-pixel rearrangement / concatenations hoisted out of the
    # forward pass).
    n = int(math.log2(cfg.image_size))
    cmax = cfg.ngf * 2 ** (n - 3)
    assert cfg.nz <= 128, "mu/logvar lane packing assumes nz <= 128"
    p = {}
    p["enc_w"] = [_pad_gemm_weight(_conv_w_to_gemm(w)) for w in raw["enc_convs"]]
    p["enc_bn"] = list(raw["enc_bns"])
    # mu/logvar head: conv1 -> lanes [0, nz), conv2 -> lanes [128, 128+nz).
    k_head = 16 * cmax
    wml = jnp.zeros((_round_up(k_head, 128), 256), jnp.float32)
    wml = wml.at[:k_head, :cfg.nz].set(_conv_w_to_gemm(raw["conv1_w"]))
    wml = wml.at[:k_head, 128:128 + cfg.nz].set(_conv_w_to_gemm(raw["conv2_w"]))
    p["head_w"] = wml.astype(jnp.bfloat16)
    bml = jnp.zeros((1, 256), jnp.float32)
    bml = bml.at[0, :cfg.nz].set(raw["conv1_b"])
    bml = bml.at[0, 128:128 + cfg.nz].set(raw["conv2_b"])
    p["head_b"] = bml
    # Decoder input ConvT on the 1x1 latent: direct GEMM weight (nz, 4*4*cmax).
    p["dec_head_w"] = _pad_gemm_weight(
        jnp.transpose(raw["dec_convs"][0], (0, 2, 3, 1)).reshape(cfg.nz, 16 * cmax))
    p["dec_bn"] = list(raw["dec_bns"])
    p["dec_mid_w"] = [_pad_gemm_weight(_deconv_s2_w_to_gemm(w))
                      for w in raw["dec_convs"][1:-1]]
    p["dec_last_w"] = _pad_gemm_weight(_deconv_s2_w_to_gemm(raw["dec_convs"][-1]))
    return p


# ------------------------------ forward --------------------------------------

def vae_forward(x_nchw, params, eps, cfg):
    n = int(math.log2(cfg.image_size))
    cmax = cfg.ngf * 2 ** (n - 3)
    B = x_nchw.shape[0]
    nz = eps.shape[1]

    x = jnp.transpose(x_nchw, (0, 2, 3, 1)).astype(jnp.bfloat16)   # NCHW->NHWC once

    # ---- Encoder ----
    h = conv4s2_layer(x, params["enc_w"][0], cfg.ngf, act="leaky")
    for li, (gamma, beta) in enumerate(params["enc_bn"]):
        h = conv4s2_layer(h, params["enc_w"][li + 1], gamma.shape[0], bn=(gamma, beta))

    # ---- mu / logvar head + reparameterization (single fused GEMM) ----
    # TODO(synk): self.kl is a module-attribute side effect, not part of the forward
    # output, so it is not materialized.
    a = h.reshape(B, 16 * cmax)
    z = gemm_mu_logvar_sample(a, params["head_w"], params["head_b"], eps)[:B, :nz]

    # ---- Decoder ----
    d = deconv_head_layer(z, params["dec_head_w"], cmax, bn=params["dec_bn"][0])
    for li, w_pad in enumerate(params["dec_mid_w"]):
        gamma, beta = params["dec_bn"][li + 1]
        d = deconv4s2_layer(d, w_pad, gamma.shape[0], bn=(gamma, beta))
    d = deconv4s2_layer(d, params["dec_last_w"], cfg.nc, act="tanh",
                        out_dtype=jnp.float32)

    return jnp.transpose(d, (0, 3, 1, 2))            # NHWC -> NCHW at the boundary


if __name__ == "__main__":
    cfg = VAEConfig(nc=4, ngf=8, nz=8, image_size=16)
    B = 2
    key = jax.random.PRNGKey(0)
    kx, kp, ke = jax.random.split(key, 3)

    x = jax.random.normal(kx, (B, cfg.nc, cfg.image_size, cfg.image_size), jnp.float32)
    raw = init_raw_params(kp, cfg)
    params = pack_params(raw, cfg)
    # deterministic substitute for torch.FloatTensor(std.size()).normal_()
    eps = jax.random.normal(ke, (B, cfg.nz), jnp.float32)

    fwd = jax.jit(functools.partial(vae_forward, cfg=cfg))
    out = jax.block_until_ready(fwd(x, params, eps))
    assert out.shape == (B, cfg.nc, cfg.image_size, cfg.image_size), out.shape
    assert bool(jnp.all(jnp.isfinite(out)))
    print("KERNEL_OK")
</pallas_src>

<mosaic_0001>
module attributes {stable_mosaic.version = 11 : i64} {
  func.func @_gemm_act_kernel(%arg0: i32, %arg1: memref<128x128xbf16, #tpu.memory_space<vmem>>, %arg2: memref<128x128xbf16, #tpu.memory_space<vmem>>, %arg3: memref<128x128xbf16, #tpu.memory_space<vmem>>) attributes {dimension_semantics = [#tpu.dimension_semantics<parallel>], iteration_bounds = array<i64: 1>, scalar_prefetch = 0 : i64, scratch_operands = 0 : i64, tpu.core_type = #tpu.core_type<tc>, window_params = [{transform_indices = @transform_0, window_bounds = array<i64: 128, 128>}, {pipeline_mode = #tpu.pipeline_mode<synchronous>, transform_indices = @transform_1, window_bounds = array<i64: 128, 128>}, {transform_indices = @transform_2, window_bounds = array<i64: 128, 128>}]} {
    %c0 = arith.constant 0 : index
    %c0_0 = arith.constant 0 : index
    %0 = vector.load %arg1[%c0, %c0_0] : memref<128x128xbf16, #tpu.memory_space<vmem>>, vector<128x128xbf16>
    %c0_1 = arith.constant 0 : index
    %c0_2 = arith.constant 0 : index
    %1 = vector.load %arg2[%c0_1, %c0_2] : memref<128x128xbf16, #tpu.memory_space<vmem>>, vector<128x128xbf16>
    %cst = arith.constant dense<0.000000e+00> : vector<128x128xf32>
    %2 = tpu.matmul %0, %1, %cst {dimension_numbers = #tpu.dot_dimension_numbers<[1], [0], [0], [1], [0, 0, 1, 1], [], []>} : vector<128x128xbf16>, vector<128x128xbf16>, vector<128x128xf32> -> vector<128x128xf32>
    %cst_3 = arith.constant 0.000000e+00 : f32
    %3 = vector.broadcast %cst_3 : f32 to vector<128x128xf32>
    %4 = arith.cmpf oge, %2, %3 : vector<128x128xf32>
    %cst_4 = arith.constant 2.000000e-01 : f32
    %5 = vector.broadcast %cst_4 : f32 to vector<128x128xf32>
    %6 = arith.mulf %5, %2 : vector<128x128xf32>
    %7 = arith.select %4, %2, %6 : vector<128x128xi1>, vector<128x128xf32>
    %8 = arith.truncf %7 : vector<128x128xf32> to vector<128x128xbf16>
    %c0_5 = arith.constant 0 : index
    %c0_6 = arith.constant 0 : index
    %9 = vector.load %arg3[%c0_5, %c0_6] : memref<128x128xbf16, #tpu.memory_space<vmem>>, vector<128x128xbf16>
    tpu.vector_store %arg3[%c0_5, %c0_6], %8 {strides = array<i32>} : memref<128x128xbf16, #tpu.memory_space<vmem>>, vector<128x128xbf16>,
    return
  }
  func.func @transform_0(%arg0: i32) -> (i32, i32) {
    %c0_i32 = arith.constant 0 : i32
    %c0_i32_0 = arith.constant 0 : i32
    return %arg0, %c0_i32 : i32, i32
  }
  func.func @transform_1(%arg0: i32) -> (i32, i32) {
    %c0_i32 = arith.constant 0 : i32
    %c0_i32_0 = arith.constant 0 : i32
    %c0_i32_1 = arith.constant 0 : i32
    return %c0_i32, %c0_i32_0 : i32, i32
  }
  func.func @transform_2(%arg0: i32) -> (i32, i32) {
    %c0_i32 = arith.constant 0 : i32
    %c0_i32_0 = arith.constant 0 : i32
    return %arg0, %c0_i32 : i32, i32
  }
}

module attributes {stable_mosaic.version = 11 : i64} {
  func.func @_gemm_stats_kernel(%arg0: i32, %arg1: memref<32x128xbf16, #tpu.memory_space<vmem>>, %arg2: memref<128x128xbf16, #tpu.memory_space<vmem>>, %arg3: memref<32x128xbf16, #tpu.memory_space<vmem>>, %arg4: memref<8x128xf32, #tpu.memory_space<vmem>>) attributes {dimension_semantics = [#tpu.dimension_semantics<parallel>], iteration_bounds = array<i64: 1>, scalar_prefetch = 0 : i64, scratch_operands = 0 : i64, tpu.core_type = #tpu.core_type<tc>, window_params = [{transform_indices = @transform_0, window_bounds = array<i64: 32, 128>}, {pipeline_mode = #tpu.pipeline_mode<synchronous>, transform_indices = @transform_1, window_bounds = array<i64: 128, 128>}, {transform_indices = @transform_2, window_bounds = array<i64: 32, 128>}, {transform_indices = @transform_3, window_bounds = array<i64: 8, 128>}]} {
    %c0 = arith.constant 0 : index
    %c0_0 = arith.constant 0 : index
    %0 = vector.load %arg1[%c0, %c0_0] : memref<32x128xbf16, #tpu.memory_space<vmem>>, vector<32x128xbf16>
    %c0_1 = arith.constant 0 : index
    %c0_2 = arith.constant 0 : index
    %1 = vector.load %arg2[%c0_1, %c0_2] : memref<128x128xbf16, #tpu.memory_space<vmem>>, vector<128x128xbf16>
    %cst = arith.constant dense<0.000000e+00> : vector<32x128xf32>
    %2 = tpu.matmul %0, %1, %cst {dimension_numbers = #tpu.dot_dimension_numbers<[1], [0], [0], [1], [0, 0, 1, 1], [], []>} : vector<32x128xbf16>, vector<128x128xbf16>, vector<32x128xf32> -> vector<32x128xf32>
    %3 = arith.truncf %2 : vector<32x128xf32> to vector<32x128xbf16>
    %c0_3 = arith.constant 0 : index
    %c0_4 = arith.constant 0 : index
    %4 = vector.load %arg3[%c0_3, %c0_4] : memref<32x128xbf16, #tpu.memory_space<vmem>>, vector<32x128xbf16>
    tpu.vector_store %arg3[%c0_3, %c0_4], %3 {strides = array<i32>} : memref<32x128xbf16, #tpu.memory_space<vmem>>, vector<32x128xbf16>,
    %cst_5 = arith.constant dense<0.000000e+00> : vector<128xf32>
    %5 = vector.multi_reduction <add>, %2, %cst_5 [0] : vector<32x128xf32> to vector<128xf32>
    %6 = vector.shape_cast %5 : vector<128xf32> to vector<1x128xf32>
    %c0_6 = arith.constant 0 : index
    %c0_7 = arith.constant 0 : index
    %7 = vector.load %arg4[%c0_6, %c0_7] : memref<8x128xf32, #tpu.memory_space<vmem>>, vector<1x128xf32>
    tpu.vector_store %arg4[%c0_6, %c0_7], %6 {strides = array<i32>} : memref<8x128xf32, #tpu.memory_space<vmem>>, vector<1x128xf32>,
    %8 = arith.mulf %2, %2 : vector<32x128xf32>
    %cst_8 = arith.constant dense<0.000000e+00> : vector<128xf32>
    %9 = vector.multi_reduction <add>, %8, %cst_8 [0] : vector<32x128xf32> to vector<128xf32>
    %10 = vector.shape_cast %9 : vector<128xf32> to vector<1x128xf32>
    %c1 = arith.constant 1 : index
    %c0_9 = arith.constant 0 : index
    %11 = vector.load %arg4[%c1, %c0_9] : memref<8x128xf32, #tpu.memory_space<vmem>>, vector<1x128xf32>
    tpu.vector_store %arg4[%c1, %c0_9], %10 {strides = array<i32>} : memref<8x128xf32, #tpu.memory_space<vmem>>, vector<1x128xf32>,
    return
  }
  func.func @transform_0(%arg0: i32) -> (i32, i32) {
    %c0_i32 = arith.constant 0 : i32
    %c0_i32_0 = arith.constant 0 : i32
    return %arg0, %c0_i32 : i32, i32
  }
  func.func @transform_1(%arg0: i32) -> (i32, i32) {
    %c0_i32 = arith.constant 0 : i32
    %c0_i32_0 = arith.constant 0 : i32
    %c0_i32_1 = arith.constant 0 : i32
    return %c0_i32, %c0_i32_0 : i32, i32
  }
  func.func @transform_2(%arg0: i32) -> (i32, i32) {
    %c0_i32 = arith.constant 0 : i32
    %c0_i32_0 = arith.constant 0 : i32
    return %arg0, %c0_i32 : i32, i32
  }
  func.func @transform_3(%arg0: i32) -> (i32, i32) {
    %c0_i32 = arith.constant 0 : i32
    %c0_i32_0 = arith.constant 0 : i32
    return %arg0, %c0_i32 : i32, i32
  }
}

module attributes {stable_mosaic.version = 11 : i64} {
  func.func @_affine_act_kernel(%arg0: i32, %arg1: memref<32x128xbf16, #tpu.memory_space<vmem>>, %arg2: memref<1x128xf32, #tpu.memory_space<vmem>>, %arg3: memref<1x128xf32, #tpu.memory_space<vmem>>, %arg4: memref<32x128xbf16, #tpu.memory_space<vmem>>) attributes {dimension_semantics = [#tpu.dimension_semantics<parallel>], iteration_bounds = array<i64: 1>, scalar_prefetch = 0 : i64, scratch_operands = 0 : i64, tpu.core_type = #tpu.core_type<tc>, window_params = [{transform_indices = @transform_0, window_bounds = array<i64: 32, 128>}, {pipeline_mode = #tpu.pipeline_mode<synchronous>, transform_indices = @transform_1, window_bounds = array<i64: 1, 128>}, {pipeline_mode = #tpu.pipeline_mode<synchronous>, transform_indices = @transform_2, window_bounds = array<i64: 1, 128>}, {transform_indices = @transform_3, window_bounds = array<i64: 32, 128>}]} {
    %c0 = arith.constant 0 : index
    %c0_0 = arith.constant 0 : index
    %0 = vector.load %arg1[%c0, %c0_0] : memref<32x128xbf16, #tpu.memory_space<vmem>>, vector<32x128xbf16>
    %1 = arith.extf %0 : vector<32x128xbf16> to vector<32x128xf32>
    %c0_1 = arith.constant 0 : index
    %c0_2 = arith.constant 0 : index
    %2 = vector.load %arg2[%c0_1, %c0_2] : memref<1x128xf32, #tpu.memory_space<vmem>>, vector<1x128xf32>
    %3 = vector.broadcast %2 : vector<1x128xf32> to vector<32x128xf32>
    %4 = arith.mulf %1, %3 : vector<32x128xf32>
    %c0_3 = arith.constant 0 : index
    %c0_4 = arith.constant 0 : index
    %5 = vector.load %arg3[%c0_3, %c0_4] : memref<1x128xf32, #tpu.memory_space<vmem>>, vector<1x128xf32>
    %6 = vector.broadcast %5 : vector<1x128xf32> to vector<32x128xf32>
    %7 = arith.addf %4, %6 : vector<32x128xf32>
    %cst = arith.constant 0.000000e+00 : f32
    %8 = vector.broadcast %cst : f32 to vector<32x128xf32>
    %9 = arith.cmpf oge, %7, %8 : vector<32x128xf32>
    %cst_5 = arith.constant 2.000000e-01 : f32
    %10 = vector.broadcast %cst_5 : f32 to vector<32x128xf32>
    %11 = arith.mulf %10, %7 : vector<32x128xf32>
    %12 = arith.select %9, %7, %11 : vector<32x128xi1>, vector<32x128xf32>
    %13 = arith.truncf %12 : vector<32x128xf32> to vector<32x128xbf16>
    %c0_6 = arith.constant 0 : index
    %c0_7 = arith.constant 0 : index
    %14 = vector.load %arg4[%c0_6, %c0_7] : memref<32x128xbf16, #tpu.memory_space<vmem>>, vector<32x128xbf16>
    tpu.vector_store %arg4[%c0_6, %c0_7], %13 {strides = array<i32>} : memref<32x128xbf16, #tpu.memory_space<vmem>>, vector<32x128xbf16>,
    return
  }
  func.func @transform_0(%arg0: i32) -> (i32, i32) {
    %c0_i32 = arith.constant 0 : i32
    %c0_i32_0 = arith.constant 0 : i32
    return %arg0, %c0_i32 : i32, i32
  }
  func.func @transform_1(%arg0: i32) -> (i32, i32) {
    %c0_i32 = arith.constant 0 : i32
    %c0_i32_0 = arith.constant 0 : i32
    %c0_i32_1 = arith.constant 0 : i32
    return %c0_i32, %c0_i32_0 : i32, i32
  }
  func.func @transform_2(%arg0: i32) -> (i32, i32) {
    %c0_i32 = arith.constant 0 : i32
    %c0_i32_0 = arith.constant 0 : i32
    %c0_i32_1 = arith.constant 0 : i32
    return %c0_i32, %c0_i32_0 : i32, i32
  }
  func.func @transform_3(%arg0: i32) -> (i32, i32) {
    %c0_i32 = arith.constant 0 : i32
    %c0_i32_0 = arith.constant 0 : i32
    return %arg0, %c0_i32 : i32, i32
  }
}

module attributes {stable_mosaic.version = 11 : i64} {
  func.func @_gemm_sampler_kernel(%arg0: i32, %arg1: memref<16x256xbf16, #tpu.memory_space<vmem>>, %arg2: memref<256x256xbf16, #tpu.memory_space<vmem>>, %arg3: memref<1x256xf32, #tpu.memory_space<vmem>>, %arg4: memref<16x128xf32, #tpu.memory_space<vmem>>, %arg5: memref<16x128xbf16, #tpu.memory_space<vmem>>) attributes {dimension_semantics = [#tpu.dimension_semantics<parallel>], iteration_bounds = array<i64: 1>, scalar_prefetch = 0 : i64, scratch_operands = 0 : i64, tpu.core_type = #tpu.core_type<tc>, window_params = [{transform_indices = @transform_0, window_bounds = array<i64: 16, 256>}, {pipeline_mode = #tpu.pipeline_mode<synchronous>, transform_indices = @transform_1, window_bounds = array<i64: 256, 256>}, {pipeline_mode = #tpu.pipeline_mode<synchronous>, transform_indices = @transform_2, window_bounds = array<i64: 1, 256>}, {transform_indices = @transform_3, window_bounds = array<i64: 16, 128>}, {transform_indices = @transform_4, window_bounds = array<i64: 16, 128>}]} {
    %c0 = arith.constant 0 : index
    %c0_0 = arith.constant 0 : index
    %0 = vector.load %arg1[%c0, %c0_0] : memref<16x256xbf16, #tpu.memory_space<vmem>>, vector<16x256xbf16>
    %c0_1 = arith.constant 0 : index
    %c0_2 = arith.constant 0 : index
    %1 = vector.load %arg2[%c0_1, %c0_2] : memref<256x256xbf16, #tpu.memory_space<vmem>>, vector<256x256xbf16>
    %cst = arith.constant dense<0.000000e+00> : vector<16x256xf32>
    %2 = tpu.matmul %0, %1, %cst {dimension_numbers = #tpu.dot_dimension_numbers<[1], [0], [0], [1], [0, 0, 1, 1], [], []>} : vector<16x256xbf16>, vector<256x256xbf16>, vector<16x256xf32> -> vector<16x256xf32>
    %c0_3 = arith.constant 0 : index
    %c0_4 = arith.constant 0 : index
    %3 = vector.load %arg3[%c0_3, %c0_4] : memref<1x256xf32, #tpu.memory_space<vmem>>, vector<1x256xf32>
    %4 = vector.broadcast %3 : vector<1x256xf32> to vector<16x256xf32>
    %5 = arith.addf %2, %4 : vector<16x256xf32>
    %6 = vector.extract_strided_slice %5 {offsets = [0, 0], sizes = [16, 128], strides = [1, 1]} : vector<16x256xf32> to vector<16x128xf32>
    %7 = vector.extract_strided_slice %5 {offsets = [0, 128], sizes = [16, 128], strides = [1, 1]} : vector<16x256xf32> to vector<16x128xf32>
    %c0_5 = arith.constant 0 : index
    %c0_6 = arith.constant 0 : index
    %8 = vector.load %arg4[%c0_5, %c0_6] : memref<16x128xf32, #tpu.memory_space<vmem>>, vector<16x128xf32>
    %cst_7 = arith.constant 5.000000e-01 : f32
    %9 = vector.broadcast %cst_7 : f32 to vector<16x128xf32>
    %10 = arith.mulf %9, %7 : vector<16x128xf32>
    %11 = math.exp %10 : vector<16x128xf32>
    %12 = arith.mulf %8, %11 : vector<16x128xf32>
    %13 = arith.addf %6, %12 : vector<16x128xf32>
    %14 = arith.truncf %13 : vector<16x128xf32> to vector<16x128xbf16>
    %c0_8 = arith.constant 0 : index
    %c0_9 = arith.constant 0 : index
    %15 = vector.load %arg5[%c0_8, %c0_9] : memref<16x128xbf16, #tpu.memory_space<vmem>>, vector<16x128xbf16>
    tpu.vector_store %arg5[%c0_8, %c0_9], %14 {strides = array<i32>} : memref<16x128xbf16, #tpu.memory_space<vmem>>, vector<16x128xbf16>,
    return
  }
  func.func @transform_0(%arg0: i32) -> (i32, i32) {
    %c0_i32 = arith.constant 0 : i32
    %c0_i32_0 = arith.constant 0 : i32
    return %arg0, %c0_i32 : i32, i32
  }
  func.func @transform_1(%arg0: i32) -> (i32, i32) {
    %c0_i32 = arith.constant 0 : i32
    %c0_i32_0 = arith.constant 0 : i32
    %c0_i32_1 = arith.constant 0 : i32
    return %c0_i32, %c0_i32_0 : i32, i32
  }
  func.func @transform_2(%arg0: i32) -> (i32, i32) {
    %c0_i32 = arith.constant 0 : i32
    %c0_i32_0 = arith.constant 0 : i32
    %c0_i32_1 = arith.constant 0 : i32
    return %c0_i32, %c0_i32_0 : i32, i32
  }
  func.func @transform_3(%arg0: i32) -> (i32, i32) {
    %c0_i32 = arith.constant 0 : i32
    %c0_i32_0 = arith.constant 0 : i32
    return %arg0, %c0_i32 : i32, i32
  }
  func.func @transform_4(%arg0: i32) -> (i32, i32) {
    %c0_i32 = arith.constant 0 : i32
    %c0_i32_0 = arith.constant 0 : i32
    return %arg0, %c0_i32 : i32, i32
  }
}

module attributes {stable_mosaic.version = 11 : i64} {
  func.func @_affine_act_kernel(%arg0: i32, %arg1: memref<16x256xbf16, #tpu.memory_space<vmem>>, %arg2: memref<1x256xf32, #tpu.memory_space<vmem>>, %arg3: memref<1x256xf32, #tpu.memory_space<vmem>>, %arg4: memref<16x256xbf16, #tpu.memory_space<vmem>>) attributes {dimension_semantics = [#tpu.dimension_semantics<parallel>], iteration_bounds = array<i64: 1>, scalar_prefetch = 0 : i64, scratch_operands = 0 : i64, tpu.core_type = #tpu.core_type<tc>, window_params = [{transform_indices = @transform_0, window_bounds = array<i64: 16, 256>}, {pipeline_mode = #tpu.pipeline_mode<synchronous>, transform_indices = @transform_1, window_bounds = array<i64: 1, 256>}, {pipeline_mode = #tpu.pipeline_mode<synchronous>, transform_indices = @transform_2, window_bounds = array<i64: 1, 256>}, {transform_indices = @transform_3, window_bounds = array<i64: 16, 256>}]} {
    %c0 = arith.constant 0 : index
    %c0_0 = arith.constant 0 : index
    %0 = vector.load %arg1[%c0, %c0_0] : memref<16x256xbf16, #tpu.memory_space<vmem>>, vector<16x256xbf16>
    %1 = arith.extf %0 : vector<16x256xbf16> to vector<16x256xf32>
    %c0_1 = arith.constant 0 : index
    %c0_2 = arith.constant 0 : index
    %2 = vector.load %arg2[%c0_1, %c0_2] : memref<1x256xf32, #tpu.memory_space<vmem>>, vector<1x256xf32>
    %3 = vector.broadcast %2 : vector<1x256xf32> to vector<16x256xf32>
    %4 = arith.mulf %1, %3 : vector<16x256xf32>
    %c0_3 = arith.constant 0 : index
    %c0_4 = arith.constant 0 : index
    %5 = vector.load %arg3[%c0_3, %c0_4] : memref<1x256xf32, #tpu.memory_space<vmem>>, vector<1x256xf32>
    %6 = vector.broadcast %5 : vector<1x256xf32> to vector<16x256xf32>
    %7 = arith.addf %4, %6 : vector<16x256xf32>
    %cst = arith.constant 0.000000e+00 : f32
    %8 = vector.broadcast %cst : f32 to vector<16x256xf32>
    %9 = arith.cmpf oge, %7, %8 : vector<16x256xf32>
    %cst_5 = arith.constant 2.000000e-01 : f32
    %10 = vector.broadcast %cst_5 : f32 to vector<16x256xf32>
    %11 = arith.mulf %10, %7 : vector<16x256xf32>
    %12 = arith.select %9, %7, %11 : vector<16x256xi1>, vector<16x256xf32>
    %13 = arith.truncf %12 : vector<16x256xf32> to vector<16x256xbf16>
    %c0_6 = arith.constant 0 : index
    %c0_7 = arith.constant 0 : index
    %14 = vector.load %arg4[%c0_6, %c0_7] : memref<16x256xbf16, #tpu.memory_space<vmem>>, vector<16x256xbf16>
    tpu.vector_store %arg4[%c0_6, %c0_7], %13 {strides = array<i32>} : memref<16x256xbf16, #tpu.memory_space<vmem>>, vector<16x256xbf16>,
    return
  }
  func.func @transform_0(%arg0: i32) -> (i32, i32) {
    %c0_i32 = arith.constant 0 : i32
    %c0_i32_0 = arith.constant 0 : i32
    return %arg0, %c0_i32 : i32, i32
  }
  func.func @transform_1(%arg0: i32) -> (i32, i32) {
    %c0_i32 = arith.constant 0 : i32
    %c0_i32_0 = arith.constant 0 : i32
    %c0_i32_1 = arith.constant 0 : i32
    return %c0_i32, %c0_i32_0 : i32, i32
  }
  func.func @transform_2(%arg0: i32) -> (i32, i32) {
    %c0_i32 = arith.constant 0 : i32
    %c0_i32_0 = arith.constant 0 : i32
    %c0_i32_1 = arith.constant 0 : i32
    return %c0_i32, %c0_i32_0 : i32, i32
  }
  func.func @transform_3(%arg0: i32) -> (i32, i32) {
    %c0_i32 = arith.constant 0 : i32
    %c0_i32_0 = arith.constant 0 : i32
    return %arg0, %c0_i32 : i32, i32
  }
}

module attributes {stable_mosaic.version = 11 : i64} {
  func.func @_gemm_stats_kernel(%arg0: i32, %arg1: memref<16x128xbf16, #tpu.memory_space<vmem>>, %arg2: memref<128x256xbf16, #tpu.memory_space<vmem>>, %arg3: memref<16x256xbf16, #tpu.memory_space<vmem>>, %arg4: memref<8x256xf32, #tpu.memory_space<vmem>>) attributes {dimension_semantics = [#tpu.dimension_semantics<parallel>], iteration_bounds = array<i64: 1>, scalar_prefetch = 0 : i64, scratch_operands = 0 : i64, tpu.core_type = #tpu.core_type<tc>, window_params = [{transform_indices = @transform_0, window_bounds = array<i64: 16, 128>}, {pipeline_mode = #tpu.pipeline_mode<synchronous>, transform_indices = @transform_1, window_bounds = array<i64: 128, 256>}, {transform_indices = @transform_2, window_bounds = array<i64: 16, 256>}, {transform_indices = @transform_3, window_bounds = array<i64: 8, 256>}]} {
    %c0 = arith.constant 0 : index
    %c0_0 = arith.constant 0 : index
    %0 = vector.load %arg1[%c0, %c0_0] : memref<16x128xbf16, #tpu.memory_space<vmem>>, vector<16x128xbf16>
    %c0_1 = arith.constant 0 : index
    %c0_2 = arith.constant 0 : index
    %1 = vector.load %arg2[%c0_1, %c0_2] : memref<128x256xbf16, #tpu.memory_space<vmem>>, vector<128x256xbf16>
    %cst = arith.constant dense<0.000000e+00> : vector<16x256xf32>
    %2 = tpu.matmul %0, %1, %cst {dimension_numbers = #tpu.dot_dimension_numbers<[1], [0], [0], [1], [0, 0, 1, 1], [], []>} : vector<16x128xbf16>, vector<128x256xbf16>, vector<16x256xf32> -> vector<16x256xf32>
    %3 = arith.truncf %2 : vector<16x256xf32> to vector<16x256xbf16>
    %c0_3 = arith.constant 0 : index
    %c0_4 = arith.constant 0 : index
    %4 = vector.load %arg3[%c0_3, %c0_4] : memref<16x256xbf16, #tpu.memory_space<vmem>>, vector<16x256xbf16>
    tpu.vector_store %arg3[%c0_3, %c0_4], %3 {strides = array<i32>} : memref<16x256xbf16, #tpu.memory_space<vmem>>, vector<16x256xbf16>,
    %cst_5 = arith.constant dense<0.000000e+00> : vector<256xf32>
    %5 = vector.multi_reduction <add>, %2, %cst_5 [0] : vector<16x256xf32> to vector<256xf32>
    %6 = vector.shape_cast %5 : vector<256xf32> to vector<1x256xf32>
    %c0_6 = arith.constant 0 : index
    %c0_7 = arith.constant 0 : index
    %7 = vector.load %arg4[%c0_6, %c0_7] : memref<8x256xf32, #tpu.memory_space<vmem>>, vector<1x256xf32>
    tpu.vector_store %arg4[%c0_6, %c0_7], %6 {strides = array<i32>} : memref<8x256xf32, #tpu.memory_space<vmem>>, vector<1x256xf32>,
    %8 = arith.mulf %2, %2 : vector<16x256xf32>
    %cst_8 = arith.constant dense<0.000000e+00> : vector<256xf32>
    %9 = vector.multi_reduction <add>, %8, %cst_8 [0] : vector<16x256xf32> to vector<256xf32>
    %10 = vector.shape_cast %9 : vector<256xf32> to vector<1x256xf32>
    %c1 = arith.constant 1 : index
    %c0_9 = arith.constant 0 : index
    %11 = vector.load %arg4[%c1, %c0_9] : memref<8x256xf32, #tpu.memory_space<vmem>>, vector<1x256xf32>
    tpu.vector_store %arg4[%c1, %c0_9], %10 {strides = array<i32>} : memref<8x256xf32, #tpu.memory_space<vmem>>, vector<1x256xf32>,
    return
  }
  func.func @transform_0(%arg0: i32) -> (i32, i32) {
    %c0_i32 = arith.constant 0 : i32
    %c0_i32_0 = arith.constant 0 : i32
    return %arg0, %c0_i32 : i32, i32
  }
  func.func @transform_1(%arg0: i32) -> (i32, i32) {
    %c0_i32 = arith.constant 0 : i32
    %c0_i32_0 = arith.constant 0 : i32
    %c0_i32_1 = arith.constant 0 : i32
    return %c0_i32, %c0_i32_0 : i32, i32
  }
  func.func @transform_2(%arg0: i32) -> (i32, i32) {
    %c0_i32 = arith.constant 0 : i32
    %c0_i32_0 = arith.constant 0 : i32
    return %arg0, %c0_i32 : i32, i32
  }
  func.func @transform_3(%arg0: i32) -> (i32, i32) {
    %c0_i32 = arith.constant 0 : i32
    %c0_i32_0 = arith.constant 0 : i32
    return %arg0, %c0_i32 : i32, i32
  }
}

module attributes {stable_mosaic.version = 11 : i64} {
  func.func @_gemm_stats_kernel(%arg0: i32, %arg1: memref<32x256xbf16, #tpu.memory_space<vmem>>, %arg2: memref<256x128xbf16, #tpu.memory_space<vmem>>, %arg3: memref<32x128xbf16, #tpu.memory_space<vmem>>, %arg4: memref<8x128xf32, #tpu.memory_space<vmem>>) attributes {dimension_semantics = [#tpu.dimension_semantics<parallel>], iteration_bounds = array<i64: 1>, scalar_prefetch = 0 : i64, scratch_operands = 0 : i64, tpu.core_type = #tpu.core_type<tc>, window_params = [{transform_indices = @transform_0, window_bounds = array<i64: 32, 256>}, {pipeline_mode = #tpu.pipeline_mode<synchronous>, transform_indices = @transform_1, window_bounds = array<i64: 256, 128>}, {transform_indices = @transform_2, window_bounds = array<i64: 32, 128>}, {transform_indices = @transform_3, window_bounds = array<i64: 8, 128>}]} {
    %c0 = arith.constant 0 : index
    %c0_0 = arith.constant 0 : index
    %0 = vector.load %arg1[%c0, %c0_0] : memref<32x256xbf16, #tpu.memory_space<vmem>>, vector<32x256xbf16>
    %c0_1 = arith.constant 0 : index
    %c0_2 = arith.constant 0 : index
    %1 = vector.load %arg2[%c0_1, %c0_2] : memref<256x128xbf16, #tpu.memory_space<vmem>>, vector<256x128xbf16>
    %cst = arith.constant dense<0.000000e+00> : vector<32x128xf32>
    %2 = tpu.matmul %0, %1, %cst {dimension_numbers = #tpu.dot_dimension_numbers<[1], [0], [0], [1], [0, 0, 1, 1], [], []>} : vector<32x256xbf16>, vector<256x128xbf16>, vector<32x128xf32> -> vector<32x128xf32>
    %3 = arith.truncf %2 : vector<32x128xf32> to vector<32x128xbf16>
    %c0_3 = arith.constant 0 : index
    %c0_4 = arith.constant 0 : index
    %4 = vector.load %arg3[%c0_3, %c0_4] : memref<32x128xbf16, #tpu.memory_space<vmem>>, vector<32x128xbf16>
    tpu.vector_store %arg3[%c0_3, %c0_4], %3 {strides = array<i32>} : memref<32x128xbf16, #tpu.memory_space<vmem>>, vector<32x128xbf16>,
    %cst_5 = arith.constant dense<0.000000e+00> : vector<128xf32>
    %5 = vector.multi_reduction <add>, %2, %cst_5 [0] : vector<32x128xf32> to vector<128xf32>
    %6 = vector.shape_cast %5 : vector<128xf32> to vector<1x128xf32>
    %c0_6 = arith.constant 0 : index
    %c0_7 = arith.constant 0 : index
    %7 = vector.load %arg4[%c0_6, %c0_7] : memref<8x128xf32, #tpu.memory_space<vmem>>, vector<1x128xf32>
    tpu.vector_store %arg4[%c0_6, %c0_7], %6 {strides = array<i32>} : memref<8x128xf32, #tpu.memory_space<vmem>>, vector<1x128xf32>,
    %8 = arith.mulf %2, %2 : vector<32x128xf32>
    %cst_8 = arith.constant dense<0.000000e+00> : vector<128xf32>
    %9 = vector.multi_reduction <add>, %8, %cst_8 [0] : vector<32x128xf32> to vector<128xf32>
    %10 = vector.shape_cast %9 : vector<128xf32> to vector<1x128xf32>
    %c1 = arith.constant 1 : index
    %c0_9 = arith.constant 0 : index
    %11 = vector.load %arg4[%c1, %c0_9] : memref<8x128xf32, #tpu.memory_space<vmem>>, vector<1x128xf32>
    tpu.vector_store %arg4[%c1, %c0_9], %10 {strides = array<i32>} : memref<8x128xf32, #tpu.memory_space<vmem>>, vector<1x128xf32>,
    return
  }
  func.func @transform_0(%arg0: i32) -> (i32, i32) {
    %c0_i32 = arith.constant 0 : i32
    %c0_i32_0 = arith.constant 0 : i32
    return %arg0, %c0_i32 : i32, i32
  }
  func.func @transform_1(%arg0: i32) -> (i32, i32) {
    %c0_i32 = arith.constant 0 : i32
    %c0_i32_0 = arith.constant 0 : i32
    %c0_i32_1 = arith.constant 0 : i32
    return %c0_i32, %c0_i32_0 : i32, i32
  }
  func.func @transform_2(%arg0: i32) -> (i32, i32) {
    %c0_i32 = arith.constant 0 : i32
    %c0_i32_0 = arith.constant 0 : i32
    return %arg0, %c0_i32 : i32, i32
  }
  func.func @transform_3(%arg0: i32) -> (i32, i32) {
    %c0_i32 = arith.constant 0 : i32
    %c0_i32_0 = arith.constant 0 : i32
    return %arg0, %c0_i32 : i32, i32
  }
}

module attributes {stable_mosaic.version = 11 : i64} {
  func.func @_gemm_act_kernel(%arg0: i32, %arg1: memref<128x128xbf16, #tpu.memory_space<vmem>>, %arg2: memref<128x128xbf16, #tpu.memory_space<vmem>>, %arg3: memref<128x128xf32, #tpu.memory_space<vmem>>) attributes {dimension_semantics = [#tpu.dimension_semantics<parallel>], iteration_bounds = array<i64: 1>, scalar_prefetch = 0 : i64, scratch_operands = 0 : i64, tpu.core_type = #tpu.core_type<tc>, window_params = [{transform_indices = @transform_0, window_bounds = array<i64: 128, 128>}, {pipeline_mode = #tpu.pipeline_mode<synchronous>, transform_indices = @transform_1, window_bounds = array<i64: 128, 128>}, {transform_indices = @transform_2, window_bounds = array<i64: 128, 128>}]} {
    %c0 = arith.constant 0 : index
    %c0_0 = arith.constant 0 : index
    %0 = vector.load %arg1[%c0, %c0_0] : memref<128x128xbf16, #tpu.memory_space<vmem>>, vector<128x128xbf16>
    %c0_1 = arith.constant 0 : index
    %c0_2 = arith.constant 0 : index
    %1 = vector.load %arg2[%c0_1, %c0_2] : memref<128x128xbf16, #tpu.memory_space<vmem>>, vector<128x128xbf16>
    %cst = arith.constant dense<0.000000e+00> : vector<128x128xf32>
    %2 = tpu.matmul %0, %1, %cst {dimension_numbers = #tpu.dot_dimension_numbers<[1], [0], [0], [1], [0, 0, 1, 1], [], []>} : vector<128x128xbf16>, vector<128x128xbf16>, vector<128x128xf32> -> vector<128x128xf32>
    %3 = math.tanh %2 : vector<128x128xf32>
    %c0_3 = arith.constant 0 : index
    %c0_4 = arith.constant 0 : index
    %4 = vector.load %arg3[%c0_3, %c0_4] : memref<128x128xf32, #tpu.memory_space<vmem>>, vector<128x128xf32>
    tpu.vector_store %arg3[%c0_3, %c0_4], %3 {strides = array<i32>} : memref<128x128xf32, #tpu.memory_space<vmem>>, vector<128x128xf32>,
    return
  }
  func.func @transform_0(%arg0: i32) -> (i32, i32) {
    %c0_i32 = arith.constant 0 : i32
    %c0_i32_0 = arith.constant 0 : i32
    return %arg0, %c0_i32 : i32, i32
  }
  func.func @transform_1(%arg0: i32) -> (i32, i32) {
    %c0_i32 = arith.constant 0 : i32
    %c0_i32_0 = arith.constant 0 : i32
    %c0_i32_1 = arith.constant 0 : i32
    return %c0_i32, %c0_i32_0 : i32, i32
  }
  func.func @transform_2(%arg0: i32) -> (i32, i32) {
    %c0_i32 = arith.constant 0 : i32
    %c0_i32_0 = arith.constant 0 : i32
    return %arg0, %c0_i32 : i32, i32
  }
}

</mosaic_0001>

<bundles_post_ra>
// kernel: vae_forward.9
= control target key start
LH: loop header
LB: loop body
LE: loop exit
PB: predicated region body
PF: predicated region fallthrough
CT: control target
= control target key end

     0   :  { %s510_s1 = inlined_call_operand.vmem [shape: bf16[128,128], index: 1, kind: input, shape index: {}]   ;;  %s511_s0 = inlined_call_operand.vmem [shape: bf16[128,128], index: 0, kind: input, shape index: {}]   ;;  %s512_s2 = inlined_call_operand.vmem [shape: bf16[128,128], index: 2, kind: output, shape index: {}]  }
   0x1   :  { %v351_v0 = vld [vmem:[%s510_s1 + $0x38] sm:$0xff]  ;;  %v350_v1 = vld [vmem:[%s510_s1 + $0x30] sm:$0xff]  ;;  %v349_v2 = vld [vmem:[%s510_s1 + $0x28] sm:$0xff] }
   0x2   :  { %139 = vmatpush.bf16.msra.mxu0 %v351_v0  ;;  %399 = vmatpush.bf16.msra.mxu1 %v351_v0  ;;  %v348_v3 = vld [vmem:[%s510_s1 + $0x20] sm:$0xff]  ;;  %v347_v4 = vld [vmem:[%s510_s1 + $0x18] sm:$0xff]  ;;  %v346_v5 = vld [vmem:[%s510_s1 + $0x10] sm:$0xff] }
   0x3   :  { %400 = vmatpush.bf16.msra.mxu2 %v351_v0  ;;  %401 = vmatpush.bf16.msra.mxu3 %v351_v0  ;;  %v345_v6 = vld [vmem:[%s510_s1 + $0x8] sm:$0xff]  ;;  %v344_v7 = vld [vmem:[%s510_s1] sm:$0xff]  ;;  %v338_v9 = vld [vmem:[%s511_s0 + $0x10] sm:$0xff] }
   0x4   :  { %v336_v8 = vld [vmem:[%s511_s0] sm:$0xff]  ;;  %v342_v11 = vld [vmem:[%s511_s0 + $0x30] sm:$0xff]  ;;  %v337_v12 = vld [vmem:[%s511_s0 + $0x8] sm:$0xff] }
   0x5   :  { %v340_v10 = vld [vmem:[%s511_s0 + $0x20] sm:$0xff]  ;;  %v339_v13 = vld [vmem:[%s511_s0 + $0x18] sm:$0xff]  ;;  %v341_v14 = vld [vmem:[%s511_s0 + $0x28] sm:$0xff] }
   0x6   :  { %140 = vmatpush.bf16.msra.mxu0 %v350_v1  ;;  %402 = vmatpush.bf16.msra.mxu1 %v350_v1  ;;  %v343_v15 = vld [vmem:[%s511_s0 + $0x38] sm:$0xff] }
   0x7   :  { %403 = vmatpush.bf16.msra.mxu2 %v350_v1  ;;  %404 = vmatpush.bf16.msra.mxu3 %v350_v1 }
   0xa   :  { %141 = vmatpush.bf16.msra.mxu0 %v349_v2  ;;  %405 = vmatpush.bf16.msra.mxu1 %v349_v2 }
   0xb   :  { %406 = vmatpush.bf16.msra.mxu2 %v349_v2  ;;  %407 = vmatpush.bf16.msra.mxu3 %v349_v2 }
   0xe   :  { %142 = vmatpush.bf16.msra.mxu0 %v348_v3  ;;  %408 = vmatpush.bf16.msra.mxu1 %v348_v3 }
   0xf   :  { %409 = vmatpush.bf16.msra.mxu2 %v348_v3  ;;  %410 = vmatpush.bf16.msra.mxu3 %v348_v3 }
  0x12   :  { %143 = vmatpush.bf16.msra.mxu0 %v347_v4  ;;  %411 = vmatpush.bf16.msra.mxu1 %v347_v4 }
  0x13   :  { %412 = vmatpush.bf16.msra.mxu2 %v347_v4  ;;  %413 = vmatpush.bf16.msra.mxu3 %v347_v4 }
  0x16   :  { %144 = vmatpush.bf16.msra.mxu0 %v346_v5  ;;  %414 = vmatpush.bf16.msra.mxu1 %v346_v5 }
  0x17   :  { %415 = vmatpush.bf16.msra.mxu2 %v346_v5  ;;  %416 = vmatpush.bf16.msra.mxu3 %v346_v5 }
  0x1a   :  { %145 = vmatpush.bf16.msra.mxu0 %v345_v6  ;;  %417 = vmatpush.bf16.msra.mxu1 %v345_v6 }
  0x1b   :  { %418 = vmatpush.bf16.msra.mxu2 %v345_v6  ;;  %419 = vmatpush.bf16.msra.mxu3 %v345_v6 }
  0x1e   :  { %146 = vmatpush.bf16.msra.mxu0 %v344_v7  ;;  %420 = vmatpush.bf16.msra.mxu1 %v344_v7 }
  0x1f   :  { %421 = vmatpush.bf16.msra.mxu2 %v344_v7  ;;  %422 = vmatpush.bf16.msra.mxu3 %v344_v7 }
  0x21   :  { %147 = vmatmul.bf16.vlgmr.msra.gmra.mxu0 %v336_v8  ;;  %157 = vmatmul.bf16.vlgmr.msra.gmra.mxu1 %v338_v9 }
  0x22   :  { %167 = vmatmul.bf16.vlgmr.msra.gmra.mxu2 %v340_v10  ;;  %177 = vmatmul.bf16.vlgmr.msra.gmra.mxu3 %v342_v11 }
  0x31   :  { %152 = vmatmul.bf16.gmra.mxu0 %v337_v12  ;;  %162 = vmatmul.bf16.gmra.mxu1 %v339_v13 }
  0x32   :  { %172 = vmatmul.bf16.gmra.mxu2 %v341_v14  ;;  %182 = vmatmul.bf16.gmra.mxu3 %v343_v15 }
  0x9e   :  { %v148_v16 = vpop.f32.mrf.mxu0  ;;  %v158_v17 = vpop.f32.mrf.mxu1 }
  0x9f   :  { %v204_v18 = vmul.f32 0.2, %v148_v16  ;;  %v208_v19 = vmul.f32 0.2, %v158_v17  ;;  %vm188_vm0 = vcmp.ge.f32.partialorder %v148_v16, 0.0  ;;  %vm192_vm1 = vcmp.ge.f32.partialorder %v158_v17, 0.0 }
  0xa1   :  { %v220_v26 = vsel %vm188_vm0, %v148_v16, %v204_v18  ;;  %v224_v27 = vsel %vm192_vm1, %v158_v17, %v208_v19 }
  0xa5   :  { %v168_v20 = vpop.f32.mrf.mxu2  ;;  %v178_v21 = vpop.f32.mrf.mxu3 }
  0xa6   :  { %v150_v22 = vpop.f32.mrf.mxu0  ;;  %v160_v23 = vpop.f32.mrf.mxu1  ;;  %v212_v32 = vmul.f32 0.2, %v168_v20  ;;  %v216_v33 = vmul.f32 0.2, %v178_v21  ;;  %vm196_vm4 = vcmp.ge.f32.partialorder %v168_v20, 0.0  ;;  %vm200_vm5 = vcmp.ge.f32.partialorder %v178_v21, 0.0 }
  0xa7   :  { %vm189_vm2 = vcmp.ge.f32.partialorder %v150_v22, 0.0  ;;  %v205_v24 = vmul.f32 0.2, %v150_v22  ;;  %vm193_vm3 = vcmp.ge.f32.partialorder %v160_v23, 0.0  ;;  %v209_v25 = vmul.f32 0.2, %v160_v23 }
  0xa8   :  { %v228_v40 = vsel %vm196_vm4, %v168_v20, %v212_v32  ;;  %v232_v41 = vsel %vm200_vm5, %v178_v21, %v216_v33 }
  0xa9   :  { %v221_v28 = vsel %vm189_vm2, %v150_v22, %v205_v24  ;;  %v225_v29 = vsel %vm193_vm3, %v160_v23, %v209_v25 }
  0xaa   :  { %v355_v30 = vpack.c.bf16 %v221_v28, %v220_v26  ;;  %v365_v31 = vpack.c.bf16 %v225_v29, %v224_v27 }
  0xac   :  { %356 = vst [vmem:[%s512_s2] sm:$0xff] %v355_v30  }
  0xad   :  { %393 = vst [vmem:[%s512_s2 + $0x10] sm:$0xff] %v365_v31   ;;  %v170_v34 = vpop.f32.mrf.mxu2  ;;  %v180_v35 = vpop.f32.mrf.mxu3 }
  0xae   :  { %vm197_vm6 = vcmp.ge.f32.partialorder %v170_v34, 0.0  ;;  %v213_v36 = vmul.f32 0.2, %v170_v34  ;;  %vm201_vm7 = vcmp.ge.f32.partialorder %v180_v35, 0.0  ;;  %v217_v37 = vmul.f32 0.2, %v180_v35  ;;  %v153_v38 = vpop.f32.mrf.mxu0  ;;  %v163_v39 = vpop.f32.mrf.mxu1 }
  0xaf   :  { %v206_v46 = vmul.f32 0.2, %v153_v38  ;;  %v210_v47 = vmul.f32 0.2, %v163_v39  ;;  %vm190_vm8 = vcmp.ge.f32.partialorder %v153_v38, 0.0  ;;  %vm194_vm9 = vcmp.ge.f32.partialorder %v163_v39, 0.0 }
  0xb0   :  { %v229_v42 = vsel %vm197_vm6, %v170_v34, %v213_v36  ;;  %v233_v43 = vsel %vm201_vm7, %v180_v35, %v217_v37 }
  0xb1   :  { %v375_v44 = vpack.c.bf16 %v229_v42, %v228_v40  ;;  %v385_v45 = vpack.c.bf16 %v233_v43, %v232_v41  ;;  %v222_v54 = vsel %vm190_vm8, %v153_v38, %v206_v46  ;;  %v226_v55 = vsel %vm194_vm9, %v163_v39, %v210_v47 }
  0xb3   :  { %395 = vst [vmem:[%s512_s2 + $0x20] sm:$0xff] %v375_v44  }
  0xb4   :  { %397 = vst [vmem:[%s512_s2 + $0x30] sm:$0xff] %v385_v45  }
  0xb5   :  { %v173_v48 = vpop.f32.mrf.mxu2  ;;  %v183_v49 = vpop.f32.mrf.mxu3 }
  0xb6   :  { %v155_v50 = vpop.f32.mrf.mxu0  ;;  %v165_v51 = vpop.f32.mrf.mxu1  ;;  %v214_v60 = vmul.f32 0.2, %v173_v48  ;;  %v218_v61 = vmul.f32 0.2, %v183_v49  ;;  %vm198_vm12 = vcmp.ge.f32.partialorder %v173_v48, 0.0  ;;  %vm202_vm13 = vcmp.ge.f32.partialorder %v183_v49, 0.0 }
  0xb7   :  { %vm191_vm10 = vcmp.ge.f32.partialorder %v155_v50, 0.0  ;;  %v207_v52 = vmul.f32 0.2, %v155_v50  ;;  %vm195_vm11 = vcmp.ge.f32.partialorder %v165_v51, 0.0  ;;  %v211_v53 = vmul.f32 0.2, %v165_v51 }
  0xb8   :  { %v230_v2 = vsel %vm198_vm12, %v173_v48, %v214_v60  ;;  %v234_v3 = vsel %vm202_vm13, %v183_v49, %v218_v61 }
  0xb9   :  { %v223_v56 = vsel %vm191_vm10, %v155_v50, %v207_v52  ;;  %v227_v57 = vsel %vm195_vm11, %v165_v51, %v211_v53 }
  0xba   :  { %v360_v58 = vpack.c.bf16 %v223_v56, %v222_v54  ;;  %v370_v59 = vpack.c.bf16 %v227_v57, %v226_v55 }
  0xbc   :  { %392 = vst [vmem:[%s512_s2 + $0x8] sm:$0xff] %v360_v58  }
  0xbd   :  { %394 = vst [vmem:[%s512_s2 + $0x18] sm:$0xff] %v370_v59   ;;  %v175_v62 = vpop.f32.mrf.mxu2  ;;  %v185_v63 = vpop.f32.mrf.mxu3 }
  0xbe   :  { %vm199_vm14 = vcmp.ge.f32.partialorder %v175_v62, 0.0  ;;  %v215_v0 = vmul.f32 0.2, %v175_v62  ;;  %vm203_vm15 = vcmp.ge.f32.partialorder %v185_v63, 0.0  ;;  %v219_v1 = vmul.f32 0.2, %v185_v63 }
  0xc0   :  { %v231_v4 = vsel %vm199_vm14, %v175_v62, %v215_v0  ;;  %v235_v5 = vsel %vm203_vm15, %v185_v63, %v219_v1 }
  0xc1   :  { %v380_v6 = vpack.c.bf16 %v231_v4, %v230_v2  ;;  %v390_v7 = vpack.c.bf16 %v235_v5, %v234_v3 }
  0xc3   :  { %396 = vst [vmem:[%s512_s2 + $0x28] sm:$0xff] %v380_v6  }
  0xc4   :  { %398 = vst [vmem:[%s512_s2 + $0x38] sm:$0xff] %v390_v7  }

// kernel: vae_forward.10
= control target key start
LH: loop header
LB: loop body
LE: loop exit
PB: predicated region body
PF: predicated region fallthrough
CT: control target
= control target key end

     0   :  { %s283_s1 = inlined_call_operand.vmem [shape: bf16[128,128], index: 1, kind: input, shape index: {}]   ;;  %s284_s0 = inlined_call_operand.vmem [shape: bf16[32,128], index: 0, kind: input, shape index: {}]   ;;  %s285_s2 = inlined_call_operand.vmem [shape: bf16[32,128], index: 2, kind: output, shape index: {0}]   ;;  %s286_s3 = inlined_call_operand.vmem [shape: f32[8,128], index: 3, kind: output, shape index: {1}]  }
   0x1   :  { %v201_v0 = vld [vmem:[%s283_s1 + $0x38] sm:$0xff]  ;;  %v200_v1 = vld [vmem:[%s283_s1 + $0x30] sm:$0xff]  ;;  %v199_v2 = vld [vmem:[%s283_s1 + $0x28] sm:$0xff] }
   0x2   :  { %93 = vmatpush.bf16.msra.mxu0 %v201_v0  ;;  %213 = vmatpush.bf16.msra.mxu1 %v201_v0  ;;  %v198_v3 = vld [vmem:[%s283_s1 + $0x20] sm:$0xff]  ;;  %v197_v4 = vld [vmem:[%s283_s1 + $0x18] sm:$0xff]  ;;  %v196_v5 = vld [vmem:[%s283_s1 + $0x10] sm:$0xff] }
   0x3   :  { %v195_v6 = vld [vmem:[%s283_s1 + $0x8] sm:$0xff]  ;;  %v194_v7 = vld [vmem:[%s283_s1] sm:$0xff] }
   0x4   :  { %v192_v8 = vld [vmem:[%s284_s0] sm:$0xff]  ;;  %v193_v9 = vld [vmem:[%s284_s0 + $0x8] sm:$0xff] }
   0x6   :  { %94 = vmatpush.bf16.msra.mxu0 %v200_v1  ;;  %214 = vmatpush.bf16.msra.mxu1 %v200_v1 }
   0xa   :  { %95 = vmatpush.bf16.msra.mxu0 %v199_v2  ;;  %215 = vmatpush.bf16.msra.mxu1 %v199_v2 }
   0xe   :  { %96 = vmatpush.bf16.msra.mxu0 %v198_v3  ;;  %216 = vmatpush.bf16.msra.mxu1 %v198_v3 }
  0x12   :  { %97 = vmatpush.bf16.msra.mxu0 %v197_v4  ;;  %217 = vmatpush.bf16.msra.mxu1 %v197_v4 }
  0x16   :  { %98 = vmatpush.bf16.msra.mxu0 %v196_v5  ;;  %218 = vmatpush.bf16.msra.mxu1 %v196_v5 }
  0x1a   :  { %99 = vmatpush.bf16.msra.mxu0 %v195_v6  ;;  %219 = vmatpush.bf16.msra.mxu1 %v195_v6 }
  0x1e   :  { %100 = vmatpush.bf16.msra.mxu0 %v194_v7  ;;  %220 = vmatpush.bf16.msra.mxu1 %v194_v7 }
  0x21   :  { %101 = vmatmul.bf16.vlgmr.msra.gmra.mxu0 %v192_v8  ;;  %106 = vmatmul.bf16.vlgmr.msra.gmra.mxu1 %v193_v9 }
  0x9e   :  { %v102_v10 = vpop.f32.mrf.mxu0  ;;  %v107_v11 = vpop.f32.mrf.mxu1 }
  0x9f   :  { %v130_v12 = vmul.f32 %v102_v10, %v102_v10  ;;  %v132_v19 = vmul.f32 %v107_v11, %v107_v11 }
  0xa6   :  { %v104_v13 = vpop.f32.mrf.mxu0  ;;  %v109_v14 = vpop.f32.mrf.mxu1 }
  0xa7   :  { %v205_v15 = vpack.c.bf16 %v104_v13, %v102_v10  ;;  %v120_v16 = vadd.f32 %v104_v13, %v102_v10  ;;  %v131_v17 = vmul.f32 %v104_v13, %v104_v13  ;;  %v210_v18 = vpack.c.bf16 %v109_v14, %v107_v11 }
  0xa8   :  { %v133_v23 = vmul.f32 %v109_v14, %v109_v14 }
  0xa9   :  { %206 = vst [vmem:[%s285_s2] sm:$0xff] %v205_v15   ;;  %v134_v20 = vadd.f32 %v131_v17, %v130_v12  ;;  %v121_v21 = vadd.f32 %v120_v16, %v107_v11 }
  0xaa   :  { %212 = vst [vmem:[%s285_s2 + $0x8] sm:$0xff] %v210_v18  }
  0xab   :  { %v122_v22 = vadd.f32 %v121_v21, %v109_v14  ;;  %v135_v24 = vadd.f32 %v134_v20, %v132_v19 }
  0xad   :  { %v123_v25 = vrot.slane %v122_v22, 4  ;;  %v136_v26 = vadd.f32 %v135_v24, %v133_v23 }
  0xaf   :  { %v124_v27 = vadd.f32 %v123_v25, %v122_v22  ;;  %v137_v28 = vrot.slane %v136_v26, 4 }
  0xb1   :  { %v125_v29 = vrot.slane %v124_v27, 2  ;;  %v138_v30 = vadd.f32 %v137_v28, %v136_v26 }
  0xb3   :  { %v126_v31 = vadd.f32 %v125_v29, %v124_v27  ;;  %v139_v32 = vrot.slane %v138_v30, 2 }
  0xb5   :  { %v127_v33 = vrot.slane %v126_v31, 1  ;;  %v140_v34 = vadd.f32 %v139_v32, %v138_v30 }
  0xb7   :  { %v128_v35 = vadd.f32 %v127_v33, %v126_v31  ;;  %v141_v36 = vrot.slane %v140_v34, 1 }
  0xb9   :  { %129 = vst [vmem:[%s286_s3] sm:$0x1] %v128_v35  ;;  %v142_v37 = vadd.f32 %v141_v36, %v140_v34 }
  0xbb   :  { %143 = vst [vmem:[%s286_s3 + $0x1] sm:$0x1] %v142_v37 }

// kernel: vae_forward.11
= control target key start
LH: loop header
LB: loop body
LE: loop exit
PB: predicated region body
PF: predicated region fallthrough
CT: control target
= control target key end

     0   :  { %s122_s0 = inlined_call_operand.vmem [shape: bf16[32,128], index: 0, kind: input, shape index: {}]   ;;  %s123_s1 = inlined_call_operand.vmem [shape: f32[1,128], index: 1, kind: input, shape index: {}]   ;;  %s124_s2 = inlined_call_operand.vmem [shape: f32[1,128], index: 2, kind: input, shape index: {}]   ;;  %s125_s3 = inlined_call_operand.vmem [shape: bf16[32,128], index: 3, kind: output, shape index: {}]  }
   0x1   :  { %v63_v0 = vld [vmem:[%s122_s0] sm:$0xff]   ;;  %v80_v5 = vld [vmem:[%s122_s0 + $0x8] sm:$0xff]  }
   0x2   :  { %v82_v1 = vld [vmem:[%s123_s1] ss:$0 sm:$0xff]  ;;  %v64_v2 = vunpack.c.l.bf16 %v63_v0  ;;  %v65_v3 = vunpack.c.h.bf16 %v63_v0  ;;  %v68_v6 = vunpack.c.l.bf16 %v80_v5  ;;  %v69_v7 = vunpack.c.h.bf16 %v80_v5 }
   0x3   :  { %v83_v4 = vld [vmem:[%s124_s2] ss:$0 sm:$0xff] }
   0x4   :  { %v26_v8 = vmul.f32 %v82_v1, %v64_v2  ;;  %v27_v9 = vmul.f32 %v82_v1, %v65_v3  ;;  %v28_v10 = vmul.f32 %v82_v1, %v68_v6  ;;  %v29_v11 = vmul.f32 %v82_v1, %v69_v7 }
   0x6   :  { %v34_v12 = vadd.f32 %v83_v4, %v26_v8  ;;  %v35_v13 = vadd.f32 %v83_v4, %v27_v9  ;;  %v36_v14 = vadd.f32 %v83_v4, %v28_v10  ;;  %v37_v15 = vadd.f32 %v83_v4, %v29_v11 }
   0x8   :  { %vm38_vm0 = vcmp.ge.f32.partialorder %v34_v12, 0.0  ;;  %vm39_vm1 = vcmp.ge.f32.partialorder %v35_v13, 0.0  ;;  %v42_v16 = vmul.f32 0.2, %v34_v12  ;;  %v43_v17 = vmul.f32 0.2, %v35_v13 }
   0x9   :  { %vm40_vm2 = vcmp.ge.f32.partialorder %v36_v14, 0.0  ;;  %vm41_vm3 = vcmp.ge.f32.partialorder %v37_v15, 0.0  ;;  %v44_v18 = vmul.f32 0.2, %v36_v14  ;;  %v45_v19 = vmul.f32 0.2, %v37_v15 }
   0xa   :  { %v46_v20 = vsel %vm38_vm0, %v34_v12, %v42_v16  ;;  %v47_v21 = vsel %vm39_vm1, %v35_v13, %v43_v17 }
   0xb   :  { %v73_v22 = vpack.c.bf16 %v47_v21, %v46_v20  ;;  %v48_v23 = vsel %vm40_vm2, %v36_v14, %v44_v18  ;;  %v49_v24 = vsel %vm41_vm3, %v37_v15, %v45_v19 }
   0xc   :  { %v78_v25 = vpack.c.bf16 %v49_v24, %v48_v23 }
   0xd   :  { %74 = vst [vmem:[%s125_s3] sm:$0xff] %v73_v22  }
   0xe   :  { %81 = vst [vmem:[%s125_s3 + $0x8] sm:$0xff] %v78_v25  }

// kernel: tile.23
= control target key start
LH: loop header
LB: loop body
LE: loop exit
PB: predicated region body
PF: predicated region fallthrough
CT: control target
= control target key end

     0   :  { %s28_s0 = inlined_call_operand.vmem [shape: f32[16], index: 0, kind: input, shape index: {}]   ;;  %s29_s1 = inlined_call_operand.vmem [shape: f32[16,16], index: 1, kind: output, shape index: {}]  }
   0x1   :  { %v4_v0 = vld [vmem:[%s28_s0] ss:$0 sm:$0xff] }
   0x2   :  { %5 = vst [vmem:[%s29_s1] sm:$0xff] %v4_v0 }
   0x3   :  { %8 = vst [vmem:[%s29_s1 + $0x8] sm:$0xff] %v4_v0 }

// kernel: vae_forward.12
= control target key start
LH: loop header
LB: loop body
LE: loop exit
PB: predicated region body
PF: predicated region fallthrough
CT: control target
= control target key end

     0   :  { %s723_s1 = inlined_call_operand.vmem [shape: bf16[256,256], index: 1, kind: input, shape index: {}]   ;;  %s724_s0 = inlined_call_operand.vmem [shape: bf16[16,256], index: 0, kind: input, shape index: {}]   ;;  %s725_s2 = inlined_call_operand.vmem [shape: f32[1,256], index: 2, kind: input, shape index: {}]   ;;  %s726_s3 = inlined_call_operand.vmem [shape: f32[16,128], index: 3, kind: input, shape index: {}]   ;;  %s727_s4 = inlined_call_operand.vmem [shape: bf16[16,128], index: 4, kind: output, shape index: {}]  }
   0x1   :  { %v455_v0 = vld [vmem:[%s723_s1 + $0x74] sm:$0xf]  ;;  %v371_v1 = vld [vmem:[%s723_s1 + $0x78] sm:$0xf0]  ;;  %v453_v5 = vld [vmem:[%s723_s1 + $0x64] sm:$0xf] }
   0x2   :  { %v471_v2 = vld [vmem:[%s723_s1 + $0xf4] sm:$0xf]  ;;  %v374_v3 = vor.u32 %v455_v0, %v371_v1  ;;  %v435_v4 = vld [vmem:[%s723_s1 + $0xf8] sm:$0xf0]  ;;  %v363_v6 = vld [vmem:[%s723_s1 + $0x68] sm:$0xf0] }
   0x3   :  { %v438_v7 = vor.u32 %v471_v2, %v435_v4  ;;  %v469_v8 = vld [vmem:[%s723_s1 + $0xe4] sm:$0xf]  ;;  %v427_v9 = vld [vmem:[%s723_s1 + $0xe8] sm:$0xf0]  ;;  %v366_v10 = vor.u32 %v453_v5, %v363_v6  ;;  %v451_v11 = vld [vmem:[%s723_s1 + $0x54] sm:$0xf] }
   0x4   :  { %255 = vmatpush.bf16.msra.mxu2 %v374_v3  ;;  %v430_v12 = vor.u32 %v469_v8, %v427_v9  ;;  %v355_v13 = vld [vmem:[%s723_s1 + $0x58] sm:$0xf0]  ;;  %v369_v14 = vld [vmem:[%s723_s1 + $0x70] sm:$0xf]  ;;  %v456_v15 = vld [vmem:[%s723_s1 + $0x74] sm:$0xf0] }
   0x5   :  { %269 = vmatpush.bf16.msra.mxu3 %v438_v7  ;;  %v467_v16 = vld [vmem:[%s723_s1 + $0xd4] sm:$0xf]  ;;  %v419_v17 = vld [vmem:[%s723_s1 + $0xd8] sm:$0xf0]  ;;  %v370_v18 = vor.u32 %v456_v15, %v369_v14  ;;  %v433_v19 = vld [vmem:[%s723_s1 + $0xf0] sm:$0xf]  ;;  %v358_v22 = vor.u32 %v451_v11, %v355_v13 }
   0x6   :  { %v472_v20 = vld [vmem:[%s723_s1 + $0xf4] sm:$0xf0]  ;;  %v361_v21 = vld [vmem:[%s723_s1 + $0x60] sm:$0xf]  ;;  %v449_v23 = vld [vmem:[%s723_s1 + $0x44] sm:$0xf]  ;;  %v422_v27 = vor.u32 %v467_v16, %v419_v17 }
   0x7   :  { %227 = vmatpush.bf16.msra.mxu0 %v370_v18  ;;  %v347_v24 = vld [vmem:[%s723_s1 + $0x48] sm:$0xf0]  ;;  %v434_v25 = vor.u32 %v472_v20, %v433_v19  ;;  %v454_v26 = vld [vmem:[%s723_s1 + $0x64] sm:$0xf0]  ;;  %v465_v28 = vld [vmem:[%s723_s1 + $0xc4] sm:$0xf] }
   0x8   :  { %256 = vmatpush.bf16.msra.mxu2 %v366_v10  ;;  %v411_v29 = vld [vmem:[%s723_s1 + $0xc8] sm:$0xf0]  ;;  %v362_v30 = vor.u32 %v454_v26, %v361_v21  ;;  %v425_v31 = vld [vmem:[%s723_s1 + $0xe0] sm:$0xf]  ;;  %v470_v32 = vld [vmem:[%s723_s1 + $0xe4] sm:$0xf0]  ;;  %v350_v36 = vor.u32 %v449_v23, %v347_v24 }
   0x9   :  { %270 = vmatpush.bf16.msra.mxu3 %v430_v12  ;;  %241 = vmatpush.bf16.msra.mxu1 %v434_v25  ;;  %v353_v33 = vld [vmem:[%s723_s1 + $0x50] sm:$0xf]  ;;  %v452_v34 = vld [vmem:[%s723_s1 + $0x54] sm:$0xf0]  ;;  %v426_v35 = vor.u32 %v470_v32, %v425_v31  ;;  %v447_v37 = vld [vmem:[%s723_s1 + $0x34] sm:$0xf]  ;;  %v414_v41 = vor.u32 %v465_v28, %v411_v29 }
   0xa   :  { %v354_v38 = vor.u32 %v452_v34, %v353_v33  ;;  %v417_v39 = vld [vmem:[%s723_s1 + $0xd0] sm:$0xf]  ;;  %v468_v40 = vld [vmem:[%s723_s1 + $0xd4] sm:$0xf0]  ;;  %v339_v42 = vld [vmem:[%s723_s1 + $0x38] sm:$0xf0] }
   0xb   :  { %228 = vmatpush.bf16.msra.mxu0 %v362_v30  ;;  %v345_v43 = vld [vmem:[%s723_s1 + $0x40] sm:$0xf]  ;;  %v450_v44 = vld [vmem:[%s723_s1 + $0x44] sm:$0xf0]  ;;  %v463_v45 = vld [vmem:[%s723_s1 + $0xb4] sm:$0xf]  ;;  %v418_v47 = vor.u32 %v468_v40, %v417_v39  ;;  %v342_v50 = vor.u32 %v447_v37, %v339_v42 }
   0xc   :  { %257 = vmatpush.bf16.msra.mxu2 %v358_v22  ;;  %v403_v46 = vld [vmem:[%s723_s1 + $0xb8] sm:$0xf0]  ;;  %v409_v48 = vld [vmem:[%s723_s1 + $0xc0] sm:$0xf]  ;;  %v466_v49 = vld [vmem:[%s723_s1 + $0xc4] sm:$0xf0]  ;;  %v346_v52 = vor.u32 %v450_v44, %v345_v43 }
   0xd   :  { %271 = vmatpush.bf16.msra.mxu3 %v422_v27  ;;  %242 = vmatpush.bf16.msra.mxu1 %v426_v35  ;;  %v445_v51 = vld [vmem:[%s723_s1 + $0x24] sm:$0xf]  ;;  %v406_v53 = vor.u32 %v463_v45, %v403_v46  ;;  %v331_v54 = vld [vmem:[%s723_s1 + $0x28] sm:$0xf0]  ;;  %v337_v55 = vld [vmem:[%s723_s1 + $0x30] sm:$0xf]  ;;  %v410_v59 = vor.u32 %v466_v49, %v409_v48 }
   0xe   :  { %v448_v56 = vld [vmem:[%s723_s1 + $0x34] sm:$0xf0]  ;;  %v461_v57 = vld [vmem:[%s723_s1 + $0xa4] sm:$0xf]  ;;  %v395_v58 = vld [vmem:[%s723_s1 + $0xa8] sm:$0xf0]  ;;  %v334_v62 = vor.u32 %v445_v51, %v331_v54 }
   0xf   :  { %229 = vmatpush.bf16.msra.mxu0 %v354_v38  ;;  %v401_v60 = vld [vmem:[%s723_s1 + $0xb0] sm:$0xf]  ;;  %v464_v61 = vld [vmem:[%s723_s1 + $0xb4] sm:$0xf0]  ;;  %v443_v63 = vld [vmem:[%s723_s1 + $0x14] sm:$0xf]  ;;  %v338_v0 = vor.u32 %v448_v56, %v337_v55  ;;  %v398_v1 = vor.u32 %v461_v57, %v395_v58 }
  0x10   :  { %258 = vmatpush.bf16.msra.mxu2 %v350_v36  ;;  %v323_v2 = vld [vmem:[%s723_s1 + $0x18] sm:$0xf0]  ;;  %v329_v3 = vld [vmem:[%s723_s1 + $0x20] sm:$0xf]  ;;  %v446_v4 = vld [vmem:[%s723_s1 + $0x24] sm:$0xf0]  ;;  %v402_v7 = vor.u32 %v464_v61, %v401_v60 }
  0x11   :  { %272 = vmatpush.bf16.msra.mxu3 %v414_v41  ;;  %243 = vmatpush.bf16.msra.mxu1 %v418_v47  ;;  %v459_v5 = vld [vmem:[%s723_s1 + $0x94] sm:$0xf]  ;;  %v387_v6 = vld [vmem:[%s723_s1 + $0x98] sm:$0xf0]  ;;  %v393_v8 = vld [vmem:[%s723_s1 + $0xa0] sm:$0xf]  ;;  %v326_v10 = vor.u32 %v443_v63, %v323_v2  ;;  %v330_v12 = vor.u32 %v446_v4, %v329_v3 }
  0x12   :  { %v462_v9 = vld [vmem:[%s723_s1 + $0xa4] sm:$0xf0]  ;;  %v441_v11 = vld [vmem:[%s723_s1 + $0x4] sm:$0xf]  ;;  %v390_v13 = vor.u32 %v459_v5, %v387_v6  ;;  %v315_v14 = vld [vmem:[%s723_s1 + $0x8] sm:$0xf0] }
  0x13   :  { %230 = vmatpush.bf16.msra.mxu0 %v346_v52  ;;  %v321_v15 = vld [vmem:[%s723_s1 + $0x10] sm:$0xf]  ;;  %v444_v16 = vld [vmem:[%s723_s1 + $0x14] sm:$0xf0]  ;;  %v457_v17 = vld [vmem:[%s723_s1 + $0x84] sm:$0xf]  ;;  %v394_v19 = vor.u32 %v462_v9, %v393_v8  ;;  %v318_v22 = vor.u32 %v441_v11, %v315_v14 }
  0x14   :  { %259 = vmatpush.bf16.msra.mxu2 %v342_v50  ;;  %v379_v18 = vld [vmem:[%s723_s1 + $0x88] sm:$0xf0]  ;;  %v385_v20 = vld [vmem:[%s723_s1 + $0x90] sm:$0xf]  ;;  %v460_v21 = vld [vmem:[%s723_s1 + $0x94] sm:$0xf0]  ;;  %v322_v26 = vor.u32 %v444_v16, %v321_v15 }
  0x15   :  { %273 = vmatpush.bf16.msra.mxu3 %v406_v53  ;;  %244 = vmatpush.bf16.msra.mxu1 %v410_v59  ;;  %v305_v23 = vld [vmem:[%s724_s0] sm:$0xf]  ;;  %v440_v24 = vld [vmem:[%s724_s0 + $0x4] sm:$0xf0]  ;;  %v439_v25 = vld [vmem:[%s724_s0 + $0x4] sm:$0xf]  ;;  %v382_v27 = vor.u32 %v457_v17, %v379_v18  ;;  %v386_v31 = vor.u32 %v460_v21, %v385_v20 }
  0x16   :  { %v307_v28 = vld [vmem:[%s724_s0 + $0x8] sm:$0xf0]  ;;  %v313_v29 = vld [vmem:[%s723_s1] sm:$0xf]  ;;  %v442_v30 = vld [vmem:[%s723_s1 + $0x4] sm:$0xf0]  ;;  %v306_v32 = vor.u32 %v440_v24, %v305_v23 }
  0x17   :  { %231 = vmatpush.bf16.msra.mxu0 %v338_v0  ;;  %v377_v33 = vld [vmem:[%s723_s1 + $0x80] sm:$0xf]  ;;  %v458_v34 = vld [vmem:[%s723_s1 + $0x84] sm:$0xf0]  ;;  %v310_v35 = vor.u32 %v439_v25, %v307_v28  ;;  %v314_v36 = vor.u32 %v442_v30, %v313_v29 }
  0x18   :  { %260 = vmatpush.bf16.msra.mxu2 %v334_v62  ;;  %v378_v37 = vor.u32 %v458_v34, %v377_v33  ;;  %v51_v38 = vld [vmem:[%s725_s2] sm:$0x3]  ;;  %v284_v61 = vld [vmem:[%s726_s3 + $0x8] sm:$0xff] }
  0x19   :  { %274 = vmatpush.bf16.msra.mxu3 %v398_v1  ;;  %245 = vmatpush.bf16.msra.mxu1 %v402_v7  ;;  %v54_v39 = vperm.slane %v51_v38, 1  ;;  %v53_v53 = vperm.slane %v51_v38, 0  ;;  %v283_v58 = vld [vmem:[%s726_s3] sm:$0xff] }
  0x1b   :  { %232 = vmatpush.bf16.msra.mxu0 %v330_v12 }
  0x1c   :  { %261 = vmatpush.bf16.msra.mxu2 %v326_v10 }
  0x1d   :  { %275 = vmatpush.bf16.msra.mxu3 %v390_v13  ;;  %246 = vmatpush.bf16.msra.mxu1 %v394_v19 }
  0x1f   :  { %233 = vmatpush.bf16.msra.mxu0 %v322_v26 }
  0x20   :  { %262 = vmatpush.bf16.msra.mxu2 %v318_v22 }
  0x21   :  { %276 = vmatpush.bf16.msra.mxu3 %v382_v27  ;;  %247 = vmatpush.bf16.msra.mxu1 %v386_v31 }
  0x23   :  { %263 = vmatmul.bf16.vlgmr.msra.gmra.mxu2 %v306_v32  ;;  %234 = vmatpush.bf16.msra.mxu0 %v314_v36 }
  0x24   :  { %277 = vmatmul.bf16.vlgmr.msra.gmra.mxu3 %v310_v35 }
  0x25   :  { %248 = vmatpush.bf16.msra.mxu1 %v378_v37 }
  0x26   :  { %235 = vmatmul.bf16.vlgmr.msra.gmra.mxu0 %v306_v32 }
  0x28   :  { %249 = vmatmul.bf16.vlgmr.msra.gmra.mxu1 %v310_v35 }
  0xa3   :  { %v236_v45 = vpop.f32.mrf.mxu0 }
  0xa4   :  { %v237_v56 = vadd.f32 %v236_v45, %v53_v53 }
  0xa5   :  { %v250_v50 = vpop.f32.mrf.mxu1 }
  0xa6   :  { %v264_v40 = vpop.f32.mrf.mxu2  ;;  %v251_v62 = vadd.f32 %v250_v50, %v237_v56 }
  0xa7   :  { %v265_v41 = vadd.f32 %v264_v40, %v54_v39  ;;  %v278_v42 = vpop.f32.mrf.mxu3 }
  0xa9   :  { %v279_v43 = vadd.f32 %v278_v42, %v265_v41 }
  0xab   :  { %v285_v44 = vmul.f32 0.5, %v279_v43  ;;  %v238_v55 = vpop.f32.mrf.mxu0 }
  0xac   :  { %v239_v59 = vadd.f32 %v238_v55, %v53_v53 }
  0xad   :  { %v287_v47 = vmul.f32 1.442695, %v285_v44  ;;  %v252_v60 = vpop.f32.mrf.mxu1 }
  0xae   :  { %v266_v46 = vpop.f32.mrf.mxu2  ;;  %v253_v1 = vadd.f32 %v252_v60, %v239_v59 }
  0xaf   :  { %v267_v48 = vadd.f32 %v266_v46, %v54_v39  ;;  %v280_v49 = vpop.f32.mrf.mxu3  ;;  %478 = vpow2.f32 %v287_v47 }
  0xb1   :  { %v281_v51 = vadd.f32 %v280_v49, %v267_v48 }
  0xb3   :  { %v286_v52 = vmul.f32 0.5, %v281_v51 }
  0xb5   :  { %v289_v54 = vmul.f32 1.442695, %v286_v52  ;;  %v479_v57 = vpop.eup %478 }
  0xb6   :  { %v291_v63 = vmul.f32 %v479_v57, %v283_v58 }
  0xb7   :  { %480 = vpow2.f32 %v289_v54 }
  0xb8   :  { %v293_v3 = vadd.f32 %v291_v63, %v251_v62 }
  0xbd   :  { %v481_v0 = vpop.eup %480 }
  0xbe   :  { %v292_v2 = vmul.f32 %v481_v0, %v284_v61 }
  0xc0   :  { %v294_v4 = vadd.f32 %v292_v2, %v253_v1 }
  0xc2   :  { %v476_v5 = vpack.c.bf16 %v294_v4, %v293_v3 }
  0xc4   :  { %477 = vst [vmem:[%s727_s4] sm:$0xff] %v476_v5  }

// kernel: vae_forward.14
= control target key start
LH: loop header
LB: loop body
LE: loop exit
PB: predicated region body
PF: predicated region fallthrough
CT: control target
= control target key end

     0   :  { %s98_s0 = inlined_call_operand.vmem [shape: bf16[16,256], index: 0, kind: input, shape index: {}]   ;;  %s99_s1 = inlined_call_operand.vmem [shape: f32[1,256], index: 1, kind: input, shape index: {}]   ;;  %s100_s2 = inlined_call_operand.vmem [shape: f32[1,256], index: 2, kind: input, shape index: {}]   ;;  %s101_s3 = inlined_call_operand.vmem [shape: bf16[16,256], index: 3, kind: output, shape index: {}]  }
   0x1   :  { %v14_v0 = vld [vmem:[%s98_s0] sm:$0xff]  ;;  %v15_v7 = vld [vmem:[%s98_s0 + $0x8] sm:$0xff] }
   0x2   :  { %v20_v1 = vld [vmem:[%s99_s1] sm:$0x3]  ;;  %v16_v3 = vunpack.c.l.bf16 %v14_v0  ;;  %v17_v4 = vunpack.c.h.bf16 %v14_v0  ;;  %v18_v10 = vunpack.c.l.bf16 %v15_v7  ;;  %v19_v11 = vunpack.c.h.bf16 %v15_v7 }
   0x3   :  { %v30_v2 = vld [vmem:[%s100_s2] sm:$0x3]  ;;  %v22_v5 = vperm.slane %v20_v1, 0  ;;  %v23_v6 = vperm.slane %v20_v1, 1 }
   0x4   :  { %v32_v8 = vperm.slane %v30_v2, 0  ;;  %v33_v9 = vperm.slane %v30_v2, 1 }
   0x5   :  { %v26_v12 = vmul.f32 %v22_v5, %v16_v3  ;;  %v27_v13 = vmul.f32 %v23_v6, %v17_v4  ;;  %v28_v14 = vmul.f32 %v22_v5, %v18_v10  ;;  %v29_v15 = vmul.f32 %v23_v6, %v19_v11 }
   0x7   :  { %v36_v16 = vadd.f32 %v32_v8, %v26_v12  ;;  %v37_v17 = vadd.f32 %v33_v9, %v27_v13  ;;  %v38_v18 = vadd.f32 %v32_v8, %v28_v14  ;;  %v39_v19 = vadd.f32 %v33_v9, %v29_v15 }
   0x9   :  { %vm40_vm0 = vcmp.ge.f32.partialorder %v36_v16, 0.0  ;;  %vm41_vm1 = vcmp.ge.f32.partialorder %v37_v17, 0.0  ;;  %v44_v20 = vmul.f32 0.2, %v36_v16  ;;  %v45_v21 = vmul.f32 0.2, %v37_v17 }
   0xa   :  { %vm42_vm2 = vcmp.ge.f32.partialorder %v38_v18, 0.0  ;;  %vm43_vm3 = vcmp.ge.f32.partialorder %v39_v19, 0.0  ;;  %v46_v22 = vmul.f32 0.2, %v38_v18  ;;  %v47_v23 = vmul.f32 0.2, %v39_v19 }
   0xb   :  { %v48_v24 = vsel %vm40_vm0, %v36_v16, %v44_v20  ;;  %v49_v25 = vsel %vm41_vm1, %v37_v17, %v45_v21 }
   0xc   :  { %v52_v26 = vpack.c.bf16 %v49_v25, %v48_v24  ;;  %v50_v27 = vsel %vm42_vm2, %v38_v18, %v46_v22  ;;  %v51_v28 = vsel %vm43_vm3, %v39_v19, %v47_v23 }
   0xd   :  { %v53_v29 = vpack.c.bf16 %v51_v28, %v50_v27 }
   0xe   :  { %54 = vst [vmem:[%s101_s3] sm:$0xff] %v52_v26 }
   0xf   :  { %55 = vst [vmem:[%s101_s3 + $0x8] sm:$0xff] %v53_v29 }

// kernel: vae_forward.13
= control target key start
LH: loop header
LB: loop body
LE: loop exit
PB: predicated region body
PF: predicated region fallthrough
CT: control target
= control target key end

     0   :  { %vm166_vm0 = vcmask 1040384   ;;  %s426_s1 = inlined_call_operand.vmem [shape: bf16[128,256], index: 1, kind: input, shape index: {}]   ;;  %s427_s0 = inlined_call_operand.vmem [shape: bf16[16,128], index: 0, kind: input, shape index: {}]   ;;  %s428_s2 = inlined_call_operand.vmem [shape: bf16[16,256], index: 2, kind: output, shape index: {0}]   ;;  %s429_s3 = inlined_call_operand.vmem [shape: f32[8,256], index: 3, kind: output, shape index: {1}]  }
   0x1   :  { %v271_v0 = vld [vmem:[%s426_s1 + $0x70] sm:$0xf]  ;;  %v294_v1 = vld [vmem:[%s426_s1 + $0x74] sm:$0xf0]  ;;  %v293_v2 = vld [vmem:[%s426_s1 + $0x74] sm:$0xf] }
   0x2   :  { %v272_v3 = vor.u32 %v294_v1, %v271_v0  ;;  %v273_v4 = vld [vmem:[%s426_s1 + $0x78] sm:$0xf0]  ;;  %v263_v5 = vld [vmem:[%s426_s1 + $0x60] sm:$0xf]  ;;  %v292_v6 = vld [vmem:[%s426_s1 + $0x64] sm:$0xf0] }
   0x3   :  { %v276_v7 = vor.u32 %v293_v2, %v273_v4  ;;  %v291_v8 = vld [vmem:[%s426_s1 + $0x64] sm:$0xf]  ;;  %v265_v9 = vld [vmem:[%s426_s1 + $0x68] sm:$0xf0]  ;;  %v264_v10 = vor.u32 %v292_v6, %v263_v5  ;;  %v255_v12 = vld [vmem:[%s426_s1 + $0x50] sm:$0xf] }
   0x4   :  { %117 = vmatpush.bf16.msra.mxu0 %v272_v3  ;;  %v268_v11 = vor.u32 %v291_v8, %v265_v9  ;;  %v290_v13 = vld [vmem:[%s426_s1 + $0x54] sm:$0xf0]  ;;  %v289_v14 = vld [vmem:[%s426_s1 + $0x54] sm:$0xf]  ;;  %v257_v15 = vld [vmem:[%s426_s1 + $0x58] sm:$0xf0] }
   0x5   :  { %131 = vmatpush.bf16.msra.mxu1 %v276_v7  ;;  %v256_v16 = vor.u32 %v290_v13, %v255_v12  ;;  %v260_v17 = vor.u32 %v289_v14, %v257_v15  ;;  %v247_v18 = vld [vmem:[%s426_s1 + $0x40] sm:$0xf]  ;;  %v288_v19 = vld [vmem:[%s426_s1 + $0x44] sm:$0xf0]  ;;  %v287_v20 = vld [vmem:[%s426_s1 + $0x44] sm:$0xf] }
   0x6   :  { %v249_v21 = vld [vmem:[%s426_s1 + $0x48] sm:$0xf0]  ;;  %v248_v22 = vor.u32 %v288_v19, %v247_v18  ;;  %v239_v24 = vld [vmem:[%s426_s1 + $0x30] sm:$0xf]  ;;  %v286_v25 = vld [vmem:[%s426_s1 + $0x34] sm:$0xf0] }
   0x7   :  { %v252_v23 = vor.u32 %v287_v20, %v249_v21  ;;  %v285_v26 = vld [vmem:[%s426_s1 + $0x34] sm:$0xf]  ;;  %v241_v27 = vld [vmem:[%s426_s1 + $0x38] sm:$0xf0]  ;;  %v240_v28 = vor.u32 %v286_v25, %v239_v24  ;;  %v231_v30 = vld [vmem:[%s426_s1 + $0x20] sm:$0xf] }
   0x8   :  { %118 = vmatpush.bf16.msra.mxu0 %v264_v10  ;;  %v244_v29 = vor.u32 %v285_v26, %v241_v27  ;;  %v284_v31 = vld [vmem:[%s426_s1 + $0x24] sm:$0xf0]  ;;  %v283_v32 = vld [vmem:[%s426_s1 + $0x24] sm:$0xf]  ;;  %v233_v33 = vld [vmem:[%s426_s1 + $0x28] sm:$0xf0] }
   0x9   :  { %132 = vmatpush.bf16.msra.mxu1 %v268_v11  ;;  %v232_v34 = vor.u32 %v284_v31, %v231_v30  ;;  %v236_v35 = vor.u32 %v283_v32, %v233_v33  ;;  %v223_v36 = vld [vmem:[%s426_s1 + $0x10] sm:$0xf]  ;;  %v282_v37 = vld [vmem:[%s426_s1 + $0x14] sm:$0xf0]  ;;  %v281_v38 = vld [vmem:[%s426_s1 + $0x14] sm:$0xf] }
   0xa   :  { %v225_v39 = vld [vmem:[%s426_s1 + $0x18] sm:$0xf0]  ;;  %v224_v40 = vor.u32 %v282_v37, %v223_v36  ;;  %v215_v42 = vld [vmem:[%s426_s1] sm:$0xf]  ;;  %v280_v43 = vld [vmem:[%s426_s1 + $0x4] sm:$0xf0] }
   0xb   :  { %v228_v41 = vor.u32 %v281_v38, %v225_v39  ;;  %v279_v44 = vld [vmem:[%s426_s1 + $0x4] sm:$0xf]  ;;  %v217_v45 = vld [vmem:[%s426_s1 + $0x8] sm:$0xf0]  ;;  %v216_v46 = vor.u32 %v280_v43, %v215_v42 }
   0xc   :  { %119 = vmatpush.bf16.msra.mxu0 %v256_v16  ;;  %v220_v47 = vor.u32 %v279_v44, %v217_v45  ;;  %v278_v48 = vld [vmem:[%s427_s0] sm:$0xff]  ;;  %v169_v16 = vlaneseq }
   0xd   :  { %133 = vmatpush.bf16.msra.mxu1 %v260_v17 }
   0xe   :  { %vm171_vm1 = vcmp.lt.s32.totalorder %v169_v16, 256 }
  0x10   :  { %120 = vmatpush.bf16.msra.mxu0 %v248_v22 }
  0x11   :  { %134 = vmatpush.bf16.msra.mxu1 %v252_v23 }
  0x14   :  { %121 = vmatpush.bf16.msra.mxu0 %v240_v28 }
  0x15   :  { %135 = vmatpush.bf16.msra.mxu1 %v244_v29 }
  0x18   :  { %122 = vmatpush.bf16.msra.mxu0 %v232_v34 }
  0x19   :  { %136 = vmatpush.bf16.msra.mxu1 %v236_v35 }
  0x1c   :  { %123 = vmatpush.bf16.msra.mxu0 %v224_v40 }
  0x1d   :  { %137 = vmatpush.bf16.msra.mxu1 %v228_v41 }
  0x20   :  { %124 = vmatpush.bf16.msra.mxu0 %v216_v46 }
  0x21   :  { %138 = vmatpush.bf16.msra.mxu1 %v220_v47 }
  0x23   :  { %125 = vmatmul.bf16.vlgmr.msra.gmra.mxu0 %v278_v48 }
  0x24   :  { %139 = vmatmul.bf16.vlgmr.msra.gmra.mxu1 %v278_v48 }
  0xa0   :  { %v126_v49 = vpop.f32.mrf.mxu0 }
  0xa1   :  { %v140_v50 = vpop.f32.mrf.mxu1  ;;  %v175_v53 = vmul.f32 %v126_v49, %v126_v49 }
  0xa2   :  { %v145_v51 = vpack.c.bf16 %v140_v50, %v126_v49  ;;  %v176_v57 = vmul.f32 %v140_v50, %v140_v50 }
  0xa4   :  { %147 = vst [vmem:[%s428_s2] sm:$0xff] %v145_v51 }
  0xa8   :  { %v128_v52 = vpop.f32.mrf.mxu0 }
  0xa9   :  { %v149_v54 = vadd.f32 %v128_v52, %v126_v49  ;;  %v177_v55 = vmul.f32 %v128_v52, %v128_v52  ;;  %v142_v56 = vpop.f32.mrf.mxu1 }
  0xaa   :  { %v146_v58 = vpack.c.bf16 %v142_v56, %v128_v52  ;;  %v156_v59 = vadd.f32 %v142_v56, %v140_v50  ;;  %v178_v60 = vmul.f32 %v142_v56, %v142_v56 }
  0xab   :  { %v150_v61 = vrot.slane %v149_v54, 4  ;;  %v179_v62 = vadd.f32 %v177_v55, %v175_v53 }
  0xac   :  { %148 = vst [vmem:[%s428_s2 + $0x8] sm:$0xff] %v146_v58  ;;  %v157_v63 = vrot.slane %v156_v59, 4  ;;  %v186_v0 = vadd.f32 %v178_v60, %v176_v57 }
  0xad   :  { %v151_v1 = vadd.f32 %v150_v61, %v149_v54  ;;  %v180_v2 = vrot.slane %v179_v62, 4 }
  0xae   :  { %v158_v3 = vadd.f32 %v157_v63, %v156_v59  ;;  %v187_v4 = vrot.slane %v186_v0, 4 }
  0xaf   :  { %v152_v5 = vrot.slane %v151_v1, 2  ;;  %v181_v6 = vadd.f32 %v180_v2, %v179_v62 }
  0xb0   :  { %v159_v7 = vrot.slane %v158_v3, 2  ;;  %v188_v8 = vadd.f32 %v187_v4, %v186_v0 }
  0xb1   :  { %v153_v9 = vadd.f32 %v152_v5, %v151_v1  ;;  %v182_v10 = vrot.slane %v181_v6, 2 }
  0xb2   :  { %v160_v11 = vadd.f32 %v159_v7, %v158_v3  ;;  %v189_v12 = vrot.slane %v188_v8, 2 }
  0xb3   :  { %v183_v13 = vadd.f32 %v182_v10, %v181_v6  ;;  %v154_v14 = vrot.slane %v153_v9, 1 }
  0xb4   :  { %v161_v15 = vrot.slane %v160_v11, 1  ;;  %v190_v17 = vadd.f32 %v189_v12, %v188_v8 }
  0xb5   :  { %v184_v18 = vrot.slane %v183_v13, 1  ;;  %v155_v21 = vadd.f32 %v154_v14, %v153_v9 }
  0xb6   :  { %v162_v19 = vadd.f32 %v161_v15, %v160_v11  ;;  %v191_v20 = vrot.slane %v190_v17, 1 }
  0xb7   :  { %v185_v24 = vadd.f32 %v184_v18, %v183_v13 }
  0xb8   :  { %v165_v22 = vrot.slane %v162_v19, 7  ;;  %v192_v23 = vadd.f32 %v191_v20, %v190_v17 }
  0xba   :  { %v167_v25 = vsel %vm166_vm0, %v155_v21, %v165_v22  ;;  %v195_v26 = vrot.slane %v192_v23, 7 }
  0xbb   :  { %173 = vst.msk [vmem:[%s429_s3] ss:$8 sm:$0x3] %vm171_vm1, %v167_v25 }
  0xbc   :  { %v196_v27 = vsel %vm166_vm0, %v185_v24, %v195_v26 }
  0xbd   :  { %277 = vst.msk [vmem:[%s429_s3 + $0x1] ss:$8 sm:$0x3] %vm171_vm1, %v196_v27 }

// kernel: vae_forward.15
= control target key start
LH: loop header
LB: loop body
LE: loop exit
PB: predicated region body
PF: predicated region fallthrough
CT: control target
= control target key end

     0   :  { %s474_s1 = inlined_call_operand.vmem [shape: bf16[256,128], index: 1, kind: input, shape index: {}]   ;;  %s475_s0 = inlined_call_operand.vmem [shape: bf16[32,256], index: 0, kind: input, shape index: {}]   ;;  %s476_s2 = inlined_call_operand.vmem [shape: bf16[32,128], index: 2, kind: output, shape index: {0}]   ;;  %s477_s3 = inlined_call_operand.vmem [shape: f32[8,128], index: 3, kind: output, shape index: {1}]  }
   0x1   :  { %v334_v0 = vld [vmem:[%s474_s1 + $0x38] sm:$0xff]  ;;  %v333_v2 = vld [vmem:[%s474_s1 + $0x30] sm:$0xff]  ;;  %v332_v4 = vld [vmem:[%s474_s1 + $0x28] sm:$0xff] }
   0x2   :  { %v342_v1 = vld [vmem:[%s474_s1 + $0x78] sm:$0xff]  ;;  %165 = vmatpush.bf16.msra.mxu0 %v334_v0  ;;  %354 = vmatpush.bf16.msra.mxu2 %v334_v0  ;;  %v341_v3 = vld [vmem:[%s474_s1 + $0x70] sm:$0xff]  ;;  %v340_v5 = vld [vmem:[%s474_s1 + $0x68] sm:$0xff] }
   0x3   :  { %184 = vmatpush.bf16.msra.mxu1 %v342_v1  ;;  %362 = vmatpush.bf16.msra.mxu3 %v342_v1  ;;  %v331_v6 = vld [vmem:[%s474_s1 + $0x20] sm:$0xff]  ;;  %v330_v8 = vld [vmem:[%s474_s1 + $0x18] sm:$0xff]  ;;  %v329_v10 = vld [vmem:[%s474_s1 + $0x10] sm:$0xff] }
   0x4   :  { %v339_v7 = vld [vmem:[%s474_s1 + $0x60] sm:$0xff]  ;;  %v338_v9 = vld [vmem:[%s474_s1 + $0x58] sm:$0xff]  ;;  %v337_v11 = vld [vmem:[%s474_s1 + $0x50] sm:$0xff] }
   0x5   :  { %v328_v12 = vld [vmem:[%s474_s1 + $0x8] sm:$0xff]  ;;  %v327_v14 = vld [vmem:[%s474_s1] sm:$0xff]  ;;  %v253_v18 = vld [vmem:[%s475_s0 + $0x10] sm:$0xf] }
   0x6   :  { %166 = vmatpush.bf16.msra.mxu0 %v333_v2  ;;  %355 = vmatpush.bf16.msra.mxu2 %v333_v2  ;;  %v336_v13 = vld [vmem:[%s474_s1 + $0x48] sm:$0xff]  ;;  %v335_v15 = vld [vmem:[%s474_s1 + $0x40] sm:$0xff]  ;;  %v326_v19 = vld [vmem:[%s475_s0 + $0x14] sm:$0xf0] }
   0x7   :  { %185 = vmatpush.bf16.msra.mxu1 %v341_v3  ;;  %363 = vmatpush.bf16.msra.mxu3 %v341_v3  ;;  %v245_v16 = vld [vmem:[%s475_s0] sm:$0xf]  ;;  %v324_v17 = vld [vmem:[%s475_s0 + $0x4] sm:$0xf0]  ;;  %v323_v20 = vld [vmem:[%s475_s0 + $0x4] sm:$0xf]  ;;  %v254_v25 = vor.u32 %v326_v19, %v253_v18 }
   0x8   :  { %v247_v21 = vld [vmem:[%s475_s0 + $0x8] sm:$0xf0]  ;;  %v325_v22 = vld [vmem:[%s475_s0 + $0x14] sm:$0xf]  ;;  %v255_v23 = vld [vmem:[%s475_s0 + $0x18] sm:$0xf0]  ;;  %v246_v24 = vor.u32 %v324_v17, %v245_v16 }
   0x9   :  { %v250_v26 = vor.u32 %v323_v20, %v247_v21  ;;  %v258_v27 = vor.u32 %v325_v22, %v255_v23 }
   0xa   :  { %167 = vmatpush.bf16.msra.mxu0 %v332_v4  ;;  %356 = vmatpush.bf16.msra.mxu2 %v332_v4 }
   0xb   :  { %186 = vmatpush.bf16.msra.mxu1 %v340_v5  ;;  %364 = vmatpush.bf16.msra.mxu3 %v340_v5 }
   0xe   :  { %168 = vmatpush.bf16.msra.mxu0 %v331_v6  ;;  %357 = vmatpush.bf16.msra.mxu2 %v331_v6 }
   0xf   :  { %187 = vmatpush.bf16.msra.mxu1 %v339_v7  ;;  %365 = vmatpush.bf16.msra.mxu3 %v339_v7 }
  0x12   :  { %169 = vmatpush.bf16.msra.mxu0 %v330_v8  ;;  %358 = vmatpush.bf16.msra.mxu2 %v330_v8 }
  0x13   :  { %188 = vmatpush.bf16.msra.mxu1 %v338_v9  ;;  %366 = vmatpush.bf16.msra.mxu3 %v338_v9 }
  0x16   :  { %170 = vmatpush.bf16.msra.mxu0 %v329_v10  ;;  %359 = vmatpush.bf16.msra.mxu2 %v329_v10 }
  0x17   :  { %189 = vmatpush.bf16.msra.mxu1 %v337_v11  ;;  %367 = vmatpush.bf16.msra.mxu3 %v337_v11 }
  0x1a   :  { %171 = vmatpush.bf16.msra.mxu0 %v328_v12  ;;  %360 = vmatpush.bf16.msra.mxu2 %v328_v12 }
  0x1b   :  { %190 = vmatpush.bf16.msra.mxu1 %v336_v13  ;;  %368 = vmatpush.bf16.msra.mxu3 %v336_v13 }
  0x1e   :  { %172 = vmatpush.bf16.msra.mxu0 %v327_v14  ;;  %361 = vmatpush.bf16.msra.mxu2 %v327_v14 }
  0x1f   :  { %191 = vmatpush.bf16.msra.mxu1 %v335_v15  ;;  %369 = vmatpush.bf16.msra.mxu3 %v335_v15 }
  0x21   :  { %173 = vmatmul.bf16.vlgmr.msra.gmra.mxu0 %v246_v24  ;;  %178 = vmatmul.bf16.vlgmr.msra.gmra.mxu2 %v254_v25 }
  0x22   :  { %192 = vmatmul.bf16.vlgmr.msra.gmra.mxu1 %v250_v26  ;;  %197 = vmatmul.bf16.vlgmr.msra.gmra.mxu3 %v258_v27 }
  0x9e   :  { %v174_v28 = vpop.f32.mrf.mxu0 }
  0x9f   :  { %v193_v29 = vpop.f32.mrf.mxu1 }
  0xa0   :  { %v194_v31 = vadd.f32 %v193_v29, %v174_v28 }
  0xa2   :  { %v221_v36 = vmul.f32 %v194_v31, %v194_v31 }
  0xa4   :  { %v179_v30 = vpop.f32.mrf.mxu2 }
  0xa5   :  { %v198_v32 = vpop.f32.mrf.mxu3 }
  0xa6   :  { %v176_v33 = vpop.f32.mrf.mxu0  ;;  %v199_v37 = vadd.f32 %v198_v32, %v179_v30 }
  0xa7   :  { %v195_v34 = vpop.f32.mrf.mxu1 }
  0xa8   :  { %v196_v35 = vadd.f32 %v195_v34, %v176_v33  ;;  %v223_v44 = vmul.f32 %v199_v37, %v199_v37 }
  0xaa   :  { %v346_v38 = vpack.c.bf16 %v196_v35, %v194_v31  ;;  %v211_v39 = vadd.f32 %v196_v35, %v194_v31  ;;  %v222_v40 = vmul.f32 %v196_v35, %v196_v35 }
  0xac   :  { %347 = vst [vmem:[%s476_s2] sm:$0xff] %v346_v38   ;;  %v225_v41 = vadd.f32 %v222_v40, %v221_v36  ;;  %v181_v42 = vpop.f32.mrf.mxu2  ;;  %v212_v46 = vadd.f32 %v211_v39, %v199_v37 }
  0xad   :  { %v200_v43 = vpop.f32.mrf.mxu3 }
  0xae   :  { %v201_v45 = vadd.f32 %v200_v43, %v181_v42  ;;  %v226_v50 = vadd.f32 %v225_v41, %v223_v44 }
  0xb0   :  { %v351_v47 = vpack.c.bf16 %v201_v45, %v199_v37  ;;  %v213_v48 = vadd.f32 %v212_v46, %v201_v45  ;;  %v224_v49 = vmul.f32 %v201_v45, %v201_v45 }
  0xb2   :  { %353 = vst [vmem:[%s476_s2 + $0x8] sm:$0xff] %v351_v47   ;;  %v214_v51 = vrot.slane %v213_v48, 4  ;;  %v227_v52 = vadd.f32 %v226_v50, %v224_v49 }
  0xb4   :  { %v215_v53 = vadd.f32 %v214_v51, %v213_v48  ;;  %v228_v54 = vrot.slane %v227_v52, 4 }
  0xb6   :  { %v216_v55 = vrot.slane %v215_v53, 2  ;;  %v229_v56 = vadd.f32 %v228_v54, %v227_v52 }
  0xb8   :  { %v217_v57 = vadd.f32 %v216_v55, %v215_v53  ;;  %v230_v58 = vrot.slane %v229_v56, 2 }
  0xba   :  { %v218_v59 = vrot.slane %v217_v57, 1  ;;  %v231_v60 = vadd.f32 %v230_v58, %v229_v56 }
  0xbc   :  { %v219_v61 = vadd.f32 %v218_v59, %v217_v57  ;;  %v232_v62 = vrot.slane %v231_v60, 1 }
  0xbe   :  { %220 = vst [vmem:[%s477_s3] sm:$0x1] %v219_v61  ;;  %v233_v63 = vadd.f32 %v232_v62, %v231_v60 }
  0xc0   :  { %234 = vst [vmem:[%s477_s3 + $0x1] sm:$0x1] %v233_v63 }

// kernel: vae_forward.17
= control target key start
LH: loop header
LB: loop body
LE: loop exit
PB: predicated region body
PF: predicated region fallthrough
CT: control target
= control target key end

     0   :  { %s471_s1 = inlined_call_operand.vmem [shape: bf16[128,128], index: 1, kind: input, shape index: {}]   ;;  %s472_s0 = inlined_call_operand.vmem [shape: bf16[128,128], index: 0, kind: input, shape index: {}]   ;;  %s473_s2 = inlined_call_operand.vmem [shape: f32[128,128], index: 2, kind: output, shape index: {}]  }
   0x1   :  { %v303_v0 = vld [vmem:[%s471_s1 + $0x38] sm:$0xff]  ;;  %v302_v1 = vld [vmem:[%s471_s1 + $0x30] sm:$0xff]  ;;  %v301_v2 = vld [vmem:[%s471_s1 + $0x28] sm:$0xff] }
   0x2   :  { %139 = vmatpush.bf16.msra.mxu0 %v303_v0  ;;  %304 = vmatpush.bf16.msra.mxu1 %v303_v0  ;;  %v300_v3 = vld [vmem:[%s471_s1 + $0x20] sm:$0xff]  ;;  %v299_v4 = vld [vmem:[%s471_s1 + $0x18] sm:$0xff]  ;;  %v298_v5 = vld [vmem:[%s471_s1 + $0x10] sm:$0xff] }
   0x3   :  { %305 = vmatpush.bf16.msra.mxu2 %v303_v0  ;;  %306 = vmatpush.bf16.msra.mxu3 %v303_v0  ;;  %v297_v6 = vld [vmem:[%s471_s1 + $0x8] sm:$0xff]  ;;  %v296_v7 = vld [vmem:[%s471_s1] sm:$0xff]  ;;  %v290_v9 = vld [vmem:[%s472_s0 + $0x10] sm:$0xff] }
   0x4   :  { %v288_v8 = vld [vmem:[%s472_s0] sm:$0xff]  ;;  %v294_v11 = vld [vmem:[%s472_s0 + $0x30] sm:$0xff]  ;;  %v289_v12 = vld [vmem:[%s472_s0 + $0x8] sm:$0xff] }
   0x5   :  { %v292_v10 = vld [vmem:[%s472_s0 + $0x20] sm:$0xff]  ;;  %v291_v13 = vld [vmem:[%s472_s0 + $0x18] sm:$0xff]  ;;  %v293_v14 = vld [vmem:[%s472_s0 + $0x28] sm:$0xff] }
   0x6   :  { %140 = vmatpush.bf16.msra.mxu0 %v302_v1  ;;  %307 = vmatpush.bf16.msra.mxu1 %v302_v1  ;;  %v295_v15 = vld [vmem:[%s472_s0 + $0x38] sm:$0xff] }
   0x7   :  { %308 = vmatpush.bf16.msra.mxu2 %v302_v1  ;;  %309 = vmatpush.bf16.msra.mxu3 %v302_v1 }
   0xa   :  { %141 = vmatpush.bf16.msra.mxu0 %v301_v2  ;;  %310 = vmatpush.bf16.msra.mxu1 %v301_v2 }
   0xb   :  { %311 = vmatpush.bf16.msra.mxu2 %v301_v2  ;;  %312 = vmatpush.bf16.msra.mxu3 %v301_v2 }
   0xe   :  { %142 = vmatpush.bf16.msra.mxu0 %v300_v3  ;;  %313 = vmatpush.bf16.msra.mxu1 %v300_v3 }
   0xf   :  { %314 = vmatpush.bf16.msra.mxu2 %v300_v3  ;;  %315 = vmatpush.bf16.msra.mxu3 %v300_v3 }
  0x12   :  { %143 = vmatpush.bf16.msra.mxu0 %v299_v4  ;;  %316 = vmatpush.bf16.msra.mxu1 %v299_v4 }
  0x13   :  { %317 = vmatpush.bf16.msra.mxu2 %v299_v4  ;;  %318 = vmatpush.bf16.msra.mxu3 %v299_v4 }
  0x16   :  { %144 = vmatpush.bf16.msra.mxu0 %v298_v5  ;;  %319 = vmatpush.bf16.msra.mxu1 %v298_v5 }
  0x17   :  { %320 = vmatpush.bf16.msra.mxu2 %v298_v5  ;;  %321 = vmatpush.bf16.msra.mxu3 %v298_v5 }
  0x1a   :  { %145 = vmatpush.bf16.msra.mxu0 %v297_v6  ;;  %322 = vmatpush.bf16.msra.mxu1 %v297_v6 }
  0x1b   :  { %323 = vmatpush.bf16.msra.mxu2 %v297_v6  ;;  %324 = vmatpush.bf16.msra.mxu3 %v297_v6 }
  0x1e   :  { %146 = vmatpush.bf16.msra.mxu0 %v296_v7  ;;  %325 = vmatpush.bf16.msra.mxu1 %v296_v7 }
  0x1f   :  { %326 = vmatpush.bf16.msra.mxu2 %v296_v7  ;;  %327 = vmatpush.bf16.msra.mxu3 %v296_v7 }
  0x21   :  { %147 = vmatmul.bf16.vlgmr.msra.gmra.mxu0 %v288_v8  ;;  %157 = vmatmul.bf16.vlgmr.msra.gmra.mxu1 %v290_v9 }
  0x22   :  { %167 = vmatmul.bf16.vlgmr.msra.gmra.mxu2 %v292_v10  ;;  %177 = vmatmul.bf16.vlgmr.msra.gmra.mxu3 %v294_v11 }
  0x31   :  { %152 = vmatmul.bf16.gmra.mxu0 %v289_v12  ;;  %162 = vmatmul.bf16.gmra.mxu1 %v291_v13 }
  0x32   :  { %172 = vmatmul.bf16.gmra.mxu2 %v293_v14  ;;  %182 = vmatmul.bf16.gmra.mxu3 %v295_v15 }
  0x9e   :  { %v148_v16 = vpop.f32.mrf.mxu0  ;;  %v158_v17 = vpop.f32.mrf.mxu1 }
  0x9f   :  { %328 = vtanh.f32 %v148_v16 }
  0xa0   :  { %330 = vtanh.f32 %v158_v17 }
  0xa5   :  { %v329_v18 = vpop.eup %328  ;;  %v168_v19 = vpop.f32.mrf.mxu2 }
  0xa6   :  { %v178_v20 = vpop.f32.mrf.mxu3  ;;  %v331_v21 = vpop.eup %330  ;;  %204 = vst [vmem:[%s473_s2] sm:$0xff] %v329_v18  ;;  %332 = vtanh.f32 %v168_v19 }
  0xa7   :  { %v150_v22 = vpop.f32.mrf.mxu0  ;;  %v160_v23 = vpop.f32.mrf.mxu1  ;;  %208 = vst [vmem:[%s473_s2 + $0x20] sm:$0xff] %v331_v21  ;;  %334 = vtanh.f32 %v178_v20 }
  0xa8   :  { %336 = vtanh.f32 %v150_v22 }
  0xa9   :  { %338 = vtanh.f32 %v160_v23 }
  0xac   :  { %v333_v24 = vpop.eup %332 }
  0xad   :  { %v335_v25 = vpop.eup %334  ;;  %212 = vst [vmem:[%s473_s2 + $0x40] sm:$0xff] %v333_v24  ;;  %v170_v26 = vpop.f32.mrf.mxu2 }
  0xae   :  { %v180_v27 = vpop.f32.mrf.mxu3  ;;  %v337_v28 = vpop.eup %336  ;;  %216 = vst [vmem:[%s473_s2 + $0x60] sm:$0xff] %v335_v25  ;;  %340 = vtanh.f32 %v170_v26 }
  0xaf   :  { %v153_v29 = vpop.f32.mrf.mxu0  ;;  %v163_v30 = vpop.f32.mrf.mxu1  ;;  %205 = vst [vmem:[%s473_s2 + $0x8] sm:$0xff] %v337_v28  ;;  %342 = vtanh.f32 %v180_v27 }
  0xb0   :  { %v339_v31 = vpop.eup %338  ;;  %344 = vtanh.f32 %v153_v29 }
  0xb1   :  { %209 = vst [vmem:[%s473_s2 + $0x28] sm:$0xff] %v339_v31  ;;  %346 = vtanh.f32 %v163_v30 }
  0xb4   :  { %v341_v32 = vpop.eup %340 }
  0xb5   :  { %v343_v33 = vpop.eup %342  ;;  %213 = vst [vmem:[%s473_s2 + $0x48] sm:$0xff] %v341_v32  ;;  %v173_v34 = vpop.f32.mrf.mxu2 }
  0xb6   :  { %v183_v35 = vpop.f32.mrf.mxu3  ;;  %v345_v36 = vpop.eup %344  ;;  %217 = vst [vmem:[%s473_s2 + $0x68] sm:$0xff] %v343_v33  ;;  %348 = vtanh.f32 %v173_v34 }
  0xb7   :  { %v155_v37 = vpop.f32.mrf.mxu0  ;;  %v165_v38 = vpop.f32.mrf.mxu1  ;;  %206 = vst [vmem:[%s473_s2 + $0x10] sm:$0xff] %v345_v36  ;;  %350 = vtanh.f32 %v183_v35 }
  0xb8   :  { %v347_v39 = vpop.eup %346  ;;  %352 = vtanh.f32 %v155_v37 }
  0xb9   :  { %210 = vst [vmem:[%s473_s2 + $0x30] sm:$0xff] %v347_v39  ;;  %354 = vtanh.f32 %v165_v38 }
  0xbc   :  { %v349_v40 = vpop.eup %348 }
  0xbd   :  { %v351_v41 = vpop.eup %350  ;;  %214 = vst [vmem:[%s473_s2 + $0x50] sm:$0xff] %v349_v40  ;;  %v175_v42 = vpop.f32.mrf.mxu2 }
  0xbe   :  { %v185_v43 = vpop.f32.mrf.mxu3  ;;  %v353_v44 = vpop.eup %352  ;;  %218 = vst [vmem:[%s473_s2 + $0x70] sm:$0xff] %v351_v41  ;;  %356 = vtanh.f32 %v175_v42 }
  0xbf   :  { %v355_v45 = vpop.eup %354  ;;  %207 = vst [vmem:[%s473_s2 + $0x18] sm:$0xff] %v353_v44  ;;  %358 = vtanh.f32 %v185_v43 }
  0xc0   :  { %211 = vst [vmem:[%s473_s2 + $0x38] sm:$0xff] %v355_v45 }
  0xc4   :  { %v357_v46 = vpop.eup %356 }
  0xc5   :  { %v359_v47 = vpop.eup %358  ;;  %215 = vst [vmem:[%s473_s2 + $0x58] sm:$0xff] %v357_v46 }
  0xc6   :  { %219 = vst [vmem:[%s473_s2 + $0x78] sm:$0xff] %v359_v47 }

</bundles_post_ra>
